<compile_context>
chip_gen: v6e
topology: v6e:2x2x1
jax: 0.10.0
libtpu: 0.0.40
codegen_flags: <defaults>
</compile_context>

<pallas_src>
import jax
import jax.numpy as jnp
from jax import lax
from jax.experimental import pallas as pl
from jax.experimental.pallas import tpu as pltpu


# ----------------------------------------------------------------------------
# Fused per-batch kernel: GCN -> hoisted input projection -> merged BiLSTM
# ----------------------------------------------------------------------------
def encoder_kernel(x_ref, adj_ref, gcn_w_ref, gcn_b_ref,
                   wih_ref, bih_ref, whh_ref,
                   y_ref, hn_ref, cn_ref,
                   gx_sc):
    T = x_ref.shape[1]
    Fin = x_ref.shape[2]
    G = gcn_w_ref.shape[1]
    H = whh_ref.shape[0]
    H4 = 4 * H

    # ---- GCN: relu(adj @ x @ W + b); contraction order picked statically ------
    x = x_ref[0]            # (T, Fin)  bf16
    adj = adj_ref[0]        # (T, T)    bf16
    gcn_w = gcn_w_ref[...]  # (Fin, G)  bf16
    if Fin <= G:
        # (adj @ x) @ W : dominant T x T matmul has the smaller N dim.
        ax = jnp.dot(adj, x, preferred_element_type=jnp.float32)        # (T, Fin)
        agg = jnp.dot(ax.astype(jnp.bfloat16), gcn_w,
                      preferred_element_type=jnp.float32)               # (T, G)
    else:
        support = jnp.dot(x, gcn_w, preferred_element_type=jnp.float32)  # (T, G)
        agg = jnp.dot(adj, support.astype(jnp.bfloat16),
                      preferred_element_type=jnp.float32)
    g_out = jnp.maximum(agg + gcn_b_ref[...], 0.0)                       # (T, G) f32

    # ---- hoisted LSTM input projection for BOTH directions (biases folded) ----
    # wih: (G, 8H) bf16, columns = [fwd (i,f,o,g) | bwd (i,f,o,g)]
    gates_x = jnp.dot(g_out.astype(jnp.bfloat16), wih_ref[...],
                      preferred_element_type=jnp.float32) + bih_ref[...]  # (T, 8H)
    gx_sc[...] = gates_x   # already time-major: no repack needed

    whh = whh_ref[...]     # (H, 8H) bf16, [Whh_fwd | Whh_bwd], gate order (i,f,o,g)

    # ---- merged bidirectional recurrence: fwd at t, bwd at T-1-t ---------------
    # h/c stacked on sublanes: row 0 = forward, row 1 = backward (both f32).
    def step(idx, carry):
        h, c = carry                                    # (2, H) f32
        t_f = idx
        t_b = T - 1 - idx
        # one bf16 MXU dot for both directions (f32 accumulation)
        r = jnp.dot(h.astype(jnp.bfloat16), whh,
                    preferred_element_type=jnp.float32)  # (2, 8H)
        gx_f = gx_sc[pl.ds(t_f, 1), 0:H4]                # (1, 4H)
        gx_b = gx_sc[pl.ds(t_b, 1), H4:2 * H4]           # (1, 4H)
        gates = jnp.concatenate(
            [gx_f + r[0:1, 0:H4], gx_b + r[1:2, H4:2 * H4]], axis=0)   # (2, 4H)
        s = jax.nn.sigmoid(gates[:, 0:3 * H])            # one contiguous sigmoid
        i_g = s[:, 0:H]
        f_g = s[:, H:2 * H]
        o_g = s[:, 2 * H:3 * H]
        g_g = jnp.tanh(gates[:, 3 * H:4 * H])
        c_new = f_g * c + i_g * g_g
        h_new = o_g * jnp.tanh(c_new)
        # write both halves of y directly into the resident output block
        y_ref[0, pl.ds(t_f, 1), 0:H] = h_new[0:1]        # forward half of y[t]
        y_ref[0, pl.ds(t_b, 1), H:2 * H] = h_new[1:2]    # backward half of y[T-1-t]
        return (h_new, c_new)

    z = jnp.zeros((2, H), jnp.float32)
    h_fin, c_fin = lax.fori_loop(0, T, step, (z, z), unroll=True)

    # final states, rows = (fwd, bwd); wrapper transposes to PyTorch (2, B, H)
    hn_ref[0] = h_fin
    cn_ref[0] = c_fin


def encoder_forward(x, adj, params):
    """x: (B, T, Fin) f32, adj: (B, T, T) f32. Returns (y (B,T,2H), (h_n, c_n))."""
    B, T, Fin = x.shape
    G = params["gcn_w"].shape[1]
    H = params["whh"].shape[0]

    # cast activations at the call boundary: halves HBM->VMEM DMA bytes
    x_bf = x.astype(jnp.bfloat16)
    adj_bf = adj.astype(jnp.bfloat16)

    out_shapes = (
        jax.ShapeDtypeStruct((B, T, 2 * H), jnp.float32),  # y
        jax.ShapeDtypeStruct((B, 2, H), jnp.float32),      # h_n (batch-major)
        jax.ShapeDtypeStruct((B, 2, H), jnp.float32),      # c_n (batch-major)
    )
    grid_spec = pltpu.PrefetchScalarGridSpec(
        num_scalar_prefetch=0,
        grid=(B,),
        in_specs=[
            pl.BlockSpec((1, T, Fin), lambda b: (b, 0, 0)),   # x
            pl.BlockSpec((1, T, T), lambda b: (b, 0, 0)),     # adj
            pl.BlockSpec((Fin, G), lambda b: (0, 0)),         # gcn_w (resident)
            pl.BlockSpec((1, G), lambda b: (0, 0)),           # gcn_b
            pl.BlockSpec((G, 8 * H), lambda b: (0, 0)),       # wih
            pl.BlockSpec((1, 8 * H), lambda b: (0, 0)),       # bih
            pl.BlockSpec((H, 8 * H), lambda b: (0, 0)),       # whh (fwd|bwd)
        ],
        out_specs=(
            pl.BlockSpec((1, T, 2 * H), lambda b: (b, 0, 0)),
            pl.BlockSpec((1, 2, H), lambda b: (b, 0, 0)),
            pl.BlockSpec((1, 2, H), lambda b: (b, 0, 0)),
        ),
        scratch_shapes=[pltpu.VMEM((T, 8 * H), jnp.float32)],  # hoisted gates
    )
    y, hn, cn = pl.pallas_call(
        encoder_kernel,
        out_shape=out_shapes,
        grid_spec=grid_spec,
        compiler_params=pltpu.CompilerParams(
            dimension_semantics=("parallel",)),   # megacore sharding on v7x
    )(x_bf, adj_bf,
      params["gcn_w"], params["gcn_b"],
      params["wih"], params["bih"], params["whh"])

    # tiny final-state transpose to PyTorch bidirectional layout (2, B, H)
    h_n = jnp.transpose(hn, (1, 0, 2))
    c_n = jnp.transpose(cn, (1, 0, 2))
    return y, (h_n, c_n)


# ----------------------------------------------------------------------------
# Parameter packing (PyTorch layout -> kernel layout)
# ----------------------------------------------------------------------------
def _reorder_gates(w, H):
    """PyTorch gate order (i, f, g, o) -> kernel order (i, f, o, g) on axis 0."""
    return jnp.concatenate(
        [w[0:H], w[H:2 * H], w[3 * H:4 * H], w[2 * H:3 * H]], axis=0)


class EncoderPallas:
    def __init__(self, in_size, g_out_size, h_out_size, seed=0):
        self.g_out_size = g_out_size
        self.h_out_size = h_out_size
        key = jax.random.PRNGKey(seed)
        ks = jax.random.split(key, 10)

        # GCN params (Kipf layer), init range 1/sqrt(in_size)
        kg = 1.0 / jnp.sqrt(jnp.float32(in_size))
        gcn_w = jax.random.uniform(ks[0], (in_size, g_out_size),
                                   jnp.float32, -kg, kg)
        gcn_b = jax.random.uniform(ks[1], (g_out_size,), jnp.float32, -kg, kg)

        # LSTM params, PyTorch init range 1/sqrt(hidden), PyTorch (4H, .) layout
        H = h_out_size
        H4 = 4 * H
        k = 1.0 / jnp.sqrt(jnp.float32(H))

        def u(kk, shape):
            return jax.random.uniform(kk, shape, jnp.float32, -k, k)

        w_ih_f = u(ks[2], (H4, g_out_size))
        w_hh_f = u(ks[3], (H4, H))
        b_f = u(ks[4], (H4,)) + u(ks[5], (H4,))      # b_ih + b_hh
        w_ih_b = u(ks[6], (H4, g_out_size))
        w_hh_b = u(ks[7], (H4, H))
        b_b = u(ks[8], (H4,)) + u(ks[9], (H4,))

        # Repack: reorder gates to (i,f,o,g), pre-transpose, concat directions,
        # fold biases into one (1, 8H) row; weights pre-cast to bf16 on host.
        wih = jnp.concatenate([_reorder_gates(w_ih_f, H).T,
                               _reorder_gates(w_ih_b, H).T], axis=1)       # (G, 8H)
        bih = jnp.concatenate([_reorder_gates(b_f, H),
                               _reorder_gates(b_b, H)], axis=0)[None, :]   # (1, 8H)
        whh = jnp.concatenate([_reorder_gates(w_hh_f, H).T,
                               _reorder_gates(w_hh_b, H).T], axis=1)       # (H, 8H)

        self.params = {
            "gcn_w": gcn_w.astype(jnp.bfloat16),
            "gcn_b": gcn_b.reshape(1, g_out_size),           # f32
            "wih": wih.astype(jnp.bfloat16),
            "bih": bih,                                       # f32
            "whh": whh.astype(jnp.bfloat16),
        }

    def __call__(self, x, adj):
        # dropout: identity in eval mode
        return encoder_forward(x, adj, self.params)


if __name__ == "__main__":
    B, T = 2, 8
    in_size, g_out_size, h_out_size = 16, 32, 32

    key = jax.random.PRNGKey(0)
    kx, ka = jax.random.split(key)
    x = jax.random.normal(kx, (B, T, in_size), jnp.float32)
    # random row-normalized adjacency (B, T, T)
    adj_raw = jax.random.uniform(ka, (B, T, T), jnp.float32)
    adj = adj_raw / jnp.sum(adj_raw, axis=-1, keepdims=True)

    enc = EncoderPallas(in_size, g_out_size, h_out_size, seed=0)
    y, (h_n, c_n) = enc(x, adj)
    jax.block_until_ready((y, h_n, c_n))

    assert y.shape == (B, T, 2 * h_out_size)
    assert h_n.shape == (2, B, h_out_size)
    assert c_n.shape == (2, B, h_out_size)
    assert bool(jnp.all(jnp.isfinite(y)))
    assert bool(jnp.all(jnp.isfinite(h_n)))
    assert bool(jnp.all(jnp.isfinite(c_n)))
    print("KERNEL_OK")
</pallas_src>

<mosaic_0001>
module attributes {stable_mosaic.version = 11 : i64} {
  func.func @encoder_kernel(%arg0: i32, %arg1: memref<1x8x16xbf16, #tpu.memory_space<vmem>>, %arg2: memref<1x8x8xbf16, #tpu.memory_space<vmem>>, %arg3: memref<16x32xbf16, #tpu.memory_space<vmem>>, %arg4: memref<1x32xf32, #tpu.memory_space<vmem>>, %arg5: memref<32x256xbf16, #tpu.memory_space<vmem>>, %arg6: memref<1x256xf32, #tpu.memory_space<vmem>>, %arg7: memref<32x256xbf16, #tpu.memory_space<vmem>>, %arg8: memref<1x8x64xf32, #tpu.memory_space<vmem>>, %arg9: memref<1x2x32xf32, #tpu.memory_space<vmem>>, %arg10: memref<1x2x32xf32, #tpu.memory_space<vmem>>, %arg11: memref<8x256xf32, #tpu.memory_space<vmem>>) attributes {dimension_semantics = [#tpu.dimension_semantics<parallel>], iteration_bounds = array<i64: 2>, scalar_prefetch = 0 : i64, scratch_operands = 1 : i64, tpu.core_type = #tpu.core_type<tc>, window_params = [{transform_indices = @transform_0, window_bounds = array<i64: 1, 8, 16>}, {transform_indices = @transform_1, window_bounds = array<i64: 1, 8, 8>}, {pipeline_mode = #tpu.pipeline_mode<synchronous>, transform_indices = @transform_2, window_bounds = array<i64: 16, 32>}, {pipeline_mode = #tpu.pipeline_mode<synchronous>, transform_indices = @transform_3, window_bounds = array<i64: 1, 32>}, {pipeline_mode = #tpu.pipeline_mode<synchronous>, transform_indices = @transform_4, window_bounds = array<i64: 32, 256>}, {pipeline_mode = #tpu.pipeline_mode<synchronous>, transform_indices = @transform_5, window_bounds = array<i64: 1, 256>}, {pipeline_mode = #tpu.pipeline_mode<synchronous>, transform_indices = @transform_6, window_bounds = array<i64: 32, 256>}, {transform_indices = @transform_7, window_bounds = array<i64: 1, 8, 64>}, {transform_indices = @transform_8, window_bounds = array<i64: 1, 2, 32>}, {transform_indices = @transform_9, window_bounds = array<i64: 1, 2, 32>}]} {
    %c0 = arith.constant 0 : index
    %c0_0 = arith.constant 0 : index
    %c0_1 = arith.constant 0 : index
    %0 = vector.load %arg1[%c0, %c0_0, %c0_1] : memref<1x8x16xbf16, #tpu.memory_space<vmem>>, vector<1x8x16xbf16>
    %1 = vector.shape_cast %0 : vector<1x8x16xbf16> to vector<8x16xbf16>
    %c0_2 = arith.constant 0 : index
    %c0_3 = arith.constant 0 : index
    %c0_4 = arith.constant 0 : index
    %2 = vector.load %arg2[%c0_2, %c0_3, %c0_4] : memref<1x8x8xbf16, #tpu.memory_space<vmem>>, vector<1x8x8xbf16>
    %3 = vector.shape_cast %2 : vector<1x8x8xbf16> to vector<8x8xbf16>
    %c0_5 = arith.constant 0 : index
    %c0_6 = arith.constant 0 : index
    %4 = vector.load %arg3[%c0_5, %c0_6] : memref<16x32xbf16, #tpu.memory_space<vmem>>, vector<16x32xbf16>
    %cst = arith.constant dense<0.000000e+00> : vector<8x16xf32>
    %5 = tpu.matmul %3, %1, %cst {dimension_numbers = #tpu.dot_dimension_numbers<[1], [0], [0], [1], [0, 0, 1, 1], [], []>} : vector<8x8xbf16>, vector<8x16xbf16>, vector<8x16xf32> -> vector<8x16xf32>
    %6 = arith.truncf %5 : vector<8x16xf32> to vector<8x16xbf16>
    %cst_7 = arith.constant dense<0.000000e+00> : vector<8x32xf32>
    %7 = tpu.matmul %6, %4, %cst_7 {dimension_numbers = #tpu.dot_dimension_numbers<[1], [0], [0], [1], [0, 0, 1, 1], [], []>} : vector<8x16xbf16>, vector<16x32xbf16>, vector<8x32xf32> -> vector<8x32xf32>
    %c0_8 = arith.constant 0 : index
    %c0_9 = arith.constant 0 : index
    %8 = vector.load %arg4[%c0_8, %c0_9] : memref<1x32xf32, #tpu.memory_space<vmem>>, vector<1x32xf32>
    %9 = vector.broadcast %8 : vector<1x32xf32> to vector<8x32xf32>
    %10 = arith.addf %7, %9 : vector<8x32xf32>
    %cst_10 = arith.constant 0.000000e+00 : f32
    %11 = vector.broadcast %cst_10 : f32 to vector<8x32xf32>
    %12 = arith.maximumf %10, %11 : vector<8x32xf32>
    %13 = arith.truncf %12 : vector<8x32xf32> to vector<8x32xbf16>
    %c0_11 = arith.constant 0 : index
    %c0_12 = arith.constant 0 : index
    %14 = vector.load %arg5[%c0_11, %c0_12] : memref<32x256xbf16, #tpu.memory_space<vmem>>, vector<32x256xbf16>
    %cst_13 = arith.constant dense<0.000000e+00> : vector<8x256xf32>
    %15 = tpu.matmul %13, %14, %cst_13 {dimension_numbers = #tpu.dot_dimension_numbers<[1], [0], [0], [1], [0, 0, 1, 1], [], []>} : vector<8x32xbf16>, vector<32x256xbf16>, vector<8x256xf32> -> vector<8x256xf32>
    %c0_14 = arith.constant 0 : index
    %c0_15 = arith.constant 0 : index
    %16 = vector.load %arg6[%c0_14, %c0_15] : memref<1x256xf32, #tpu.memory_space<vmem>>, vector<1x256xf32>
    %17 = vector.broadcast %16 : vector<1x256xf32> to vector<8x256xf32>
    %18 = arith.addf %15, %17 : vector<8x256xf32>
    %c0_16 = arith.constant 0 : index
    %c0_17 = arith.constant 0 : index
    %19 = vector.load %arg11[%c0_16, %c0_17] : memref<8x256xf32, #tpu.memory_space<vmem>>, vector<8x256xf32>
    tpu.vector_store %arg11[%c0_16, %c0_17], %18 {strides = array<i32>} : memref<8x256xf32, #tpu.memory_space<vmem>>, vector<8x256xf32>,
    %c0_18 = arith.constant 0 : index
    %c0_19 = arith.constant 0 : index
    %20 = vector.load %arg7[%c0_18, %c0_19] : memref<32x256xbf16, #tpu.memory_space<vmem>>, vector<32x256xbf16>
    %cst_20 = arith.constant 0.000000e+00 : f32
    %21 = vector.broadcast %cst_20 : f32 to vector<2x32xf32>
    %c0_i32 = arith.constant 0 : i32
    %c7_i32 = arith.constant 7 : i32
    %22 = arith.subi %c7_i32, %c0_i32 : i32
    %23 = arith.truncf %21 : vector<2x32xf32> to vector<2x32xbf16>
    %cst_21 = arith.constant dense<0.000000e+00> : vector<2x256xf32>
    %24 = tpu.matmul %23, %20, %cst_21 {dimension_numbers = #tpu.dot_dimension_numbers<[1], [0], [0], [1], [0, 0, 1, 1], [], []>} : vector<2x32xbf16>, vector<32x256xbf16>, vector<2x256xf32> -> vector<2x256xf32>
    %25 = arith.index_cast %c0_i32 : i32 to index
    %c0_22 = arith.constant 0 : index
    %26 = vector.load %arg11[%25, %c0_22] : memref<8x256xf32, #tpu.memory_space<vmem>>, vector<1x128xf32>
    %27 = arith.index_cast %22 : i32 to index
    %c128 = arith.constant 128 : index
    %28 = vector.load %arg11[%27, %c128] : memref<8x256xf32, #tpu.memory_space<vmem>>, vector<1x128xf32>
    %29 = vector.extract_strided_slice %24 {offsets = [0, 0], sizes = [1, 128], strides = [1, 1]} : vector<2x256xf32> to vector<1x128xf32>
    %30 = arith.addf %26, %29 : vector<1x128xf32>
    %31 = vector.extract_strided_slice %24 {offsets = [1, 128], sizes = [1, 128], strides = [1, 1]} : vector<2x256xf32> to vector<1x128xf32>
    %32 = arith.addf %28, %31 : vector<1x128xf32>
    %33 = tpu.concatenate %30, %32 in 0 : vector<1x128xf32>, vector<1x128xf32> -> vector<2x128xf32>
    %34 = vector.extract_strided_slice %33 {offsets = [0, 0], sizes = [2, 96], strides = [1, 1]} : vector<2x128xf32> to vector<2x96xf32>
    %35 = arith.negf %34 : vector<2x96xf32>
    %36 = math.exp %35 : vector<2x96xf32>
    %cst_23 = arith.constant 1.000000e+00 : f32
    %37 = vector.broadcast %cst_23 : f32 to vector<2x96xf32>
    %38 = arith.addf %37, %36 : vector<2x96xf32>
    %39 = arith.divf %37, %38 : vector<2x96xf32>
    %40 = vector.extract_strided_slice %39 {offsets = [0, 0], sizes = [2, 32], strides = [1, 1]} : vector<2x96xf32> to vector<2x32xf32>
    %41 = vector.extract_strided_slice %39 {offsets = [0, 32], sizes = [2, 32], strides = [1, 1]} : vector<2x96xf32> to vector<2x32xf32>
    %42 = vector.extract_strided_slice %39 {offsets = [0, 64], sizes = [2, 32], strides = [1, 1]} : vector<2x96xf32> to vector<2x32xf32>
    %43 = vector.extract_strided_slice %33 {offsets = [0, 96], sizes = [2, 32], strides = [1, 1]} : vector<2x128xf32> to vector<2x32xf32>
    %44 = math.tanh %43 : vector<2x32xf32>
    %45 = arith.mulf %41, %21 : vector<2x32xf32>
    %46 = arith.mulf %40, %44 : vector<2x32xf32>
    %47 = arith.addf %45, %46 : vector<2x32xf32>
    %48 = math.tanh %47 : vector<2x32xf32>
    %49 = arith.mulf %42, %48 : vector<2x32xf32>
    %50 = vector.extract_strided_slice %49 {offsets = [0, 0], sizes = [1, 32], strides = [1, 1]} : vector<2x32xf32> to vector<1x32xf32>
    %c0_24 = arith.constant 0 : index
    %51 = arith.index_cast %c0_i32 : i32 to index
    %c0_25 = arith.constant 0 : index
    %52 = vector.load %arg8[%c0_24, %51, %c0_25] : memref<1x8x64xf32, #tpu.memory_space<vmem>>, vector<1x1x32xf32>
    %53 = vector.shape_cast %52 : vector<1x1x32xf32> to vector<1x32xf32>
    %54 = vector.shape_cast %50 : vector<1x32xf32> to vector<1x1x32xf32>
    tpu.vector_store %arg8[%c0_24, %51, %c0_25], %54 {strides = array<i32>} : memref<1x8x64xf32, #tpu.memory_space<vmem>>, vector<1x1x32xf32>,
    %55 = vector.extract_strided_slice %49 {offsets = [1, 0], sizes = [1, 32], strides = [1, 1]} : vector<2x32xf32> to vector<1x32xf32>
    %c0_26 = arith.constant 0 : index
    %56 = arith.index_cast %22 : i32 to index
    %c32 = arith.constant 32 : index
    %57 = vector.load %arg8[%c0_26, %56, %c32] : memref<1x8x64xf32, #tpu.memory_space<vmem>>, vector<1x1x32xf32>
    %58 = vector.shape_cast %57 : vector<1x1x32xf32> to vector<1x32xf32>
    %59 = vector.shape_cast %55 : vector<1x32xf32> to vector<1x1x32xf32>
    tpu.vector_store %arg8[%c0_26, %56, %c32], %59 {strides = array<i32>} : memref<1x8x64xf32, #tpu.memory_space<vmem>>, vector<1x1x32xf32>,
    %c1_i32 = arith.constant 1 : i32
    %c7_i32_27 = arith.constant 7 : i32
    %60 = arith.subi %c7_i32_27, %c1_i32 : i32
    %61 = arith.truncf %49 : vector<2x32xf32> to vector<2x32xbf16>
    %cst_28 = arith.constant dense<0.000000e+00> : vector<2x256xf32>
    %62 = tpu.matmul %61, %20, %cst_28 {dimension_numbers = #tpu.dot_dimension_numbers<[1], [0], [0], [1], [0, 0, 1, 1], [], []>} : vector<2x32xbf16>, vector<32x256xbf16>, vector<2x256xf32> -> vector<2x256xf32>
    %63 = arith.index_cast %c1_i32 : i32 to index
    %c0_29 = arith.constant 0 : index
    %64 = vector.load %arg11[%63, %c0_29] : memref<8x256xf32, #tpu.memory_space<vmem>>, vector<1x128xf32>
    %65 = arith.index_cast %60 : i32 to index
    %c128_30 = arith.constant 128 : index
    %66 = vector.load %arg11[%65, %c128_30] : memref<8x256xf32, #tpu.memory_space<vmem>>, vector<1x128xf32>
    %67 = vector.extract_strided_slice %62 {offsets = [0, 0], sizes = [1, 128], strides = [1, 1]} : vector<2x256xf32> to vector<1x128xf32>
    %68 = arith.addf %64, %67 : vector<1x128xf32>
    %69 = vector.extract_strided_slice %62 {offsets = [1, 128], sizes = [1, 128], strides = [1, 1]} : vector<2x256xf32> to vector<1x128xf32>
    %70 = arith.addf %66, %69 : vector<1x128xf32>
    %71 = tpu.concatenate %68, %70 in 0 : vector<1x128xf32>, vector<1x128xf32> -> vector<2x128xf32>
    %72 = vector.extract_strided_slice %71 {offsets = [0, 0], sizes = [2, 96], strides = [1, 1]} : vector<2x128xf32> to vector<2x96xf32>
    %73 = arith.negf %72 : vector<2x96xf32>
    %74 = math.exp %73 : vector<2x96xf32>
    %cst_31 = arith.constant 1.000000e+00 : f32
    %75 = vector.broadcast %cst_31 : f32 to vector<2x96xf32>
    %76 = arith.addf %75, %74 : vector<2x96xf32>
    %77 = arith.divf %75, %76 : vector<2x96xf32>
    %78 = vector.extract_strided_slice %77 {offsets = [0, 0], sizes = [2, 32], strides = [1, 1]} : vector<2x96xf32> to vector<2x32xf32>
    %79 = vector.extract_strided_slice %77 {offsets = [0, 32], sizes = [2, 32], strides = [1, 1]} : vector<2x96xf32> to vector<2x32xf32>
    %80 = vector.extract_strided_slice %77 {offsets = [0, 64], sizes = [2, 32], strides = [1, 1]} : vector<2x96xf32> to vector<2x32xf32>
    %81 = vector.extract_strided_slice %71 {offsets = [0, 96], sizes = [2, 32], strides = [1, 1]} : vector<2x128xf32> to vector<2x32xf32>
    %82 = math.tanh %81 : vector<2x32xf32>
    %83 = arith.mulf %79, %47 : vector<2x32xf32>
    %84 = arith.mulf %78, %82 : vector<2x32xf32>
    %85 = arith.addf %83, %84 : vector<2x32xf32>
    %86 = math.tanh %85 : vector<2x32xf32>
    %87 = arith.mulf %80, %86 : vector<2x32xf32>
    %88 = vector.extract_strided_slice %87 {offsets = [0, 0], sizes = [1, 32], strides = [1, 1]} : vector<2x32xf32> to vector<1x32xf32>
    %c0_32 = arith.constant 0 : index
    %89 = arith.index_cast %c1_i32 : i32 to index
    %c0_33 = arith.constant 0 : index
    %90 = vector.load %arg8[%c0_32, %89, %c0_33] : memref<1x8x64xf32, #tpu.memory_space<vmem>>, vector<1x1x32xf32>
    %91 = vector.shape_cast %90 : vector<1x1x32xf32> to vector<1x32xf32>
    %92 = vector.shape_cast %88 : vector<1x32xf32> to vector<1x1x32xf32>
    tpu.vector_store %arg8[%c0_32, %89, %c0_33], %92 {strides = array<i32>} : memref<1x8x64xf32, #tpu.memory_space<vmem>>, vector<1x1x32xf32>,
    %93 = vector.extract_strided_slice %87 {offsets = [1, 0], sizes = [1, 32], strides = [1, 1]} : vector<2x32xf32> to vector<1x32xf32>
    %c0_34 = arith.constant 0 : index
    %94 = arith.index_cast %60 : i32 to index
    %c32_35 = arith.constant 32 : index
    %95 = vector.load %arg8[%c0_34, %94, %c32_35] : memref<1x8x64xf32, #tpu.memory_space<vmem>>, vector<1x1x32xf32>
    %96 = vector.shape_cast %95 : vector<1x1x32xf32> to vector<1x32xf32>
    %97 = vector.shape_cast %93 : vector<1x32xf32> to vector<1x1x32xf32>
    tpu.vector_store %arg8[%c0_34, %94, %c32_35], %97 {strides = array<i32>} : memref<1x8x64xf32, #tpu.memory_space<vmem>>, vector<1x1x32xf32>,
    %c2_i32 = arith.constant 2 : i32
    %c7_i32_36 = arith.constant 7 : i32
    %98 = arith.subi %c7_i32_36, %c2_i32 : i32
    %99 = arith.truncf %87 : vector<2x32xf32> to vector<2x32xbf16>
    %cst_37 = arith.constant dense<0.000000e+00> : vector<2x256xf32>
    %100 = tpu.matmul %99, %20, %cst_37 {dimension_numbers = #tpu.dot_dimension_numbers<[1], [0], [0], [1], [0, 0, 1, 1], [], []>} : vector<2x32xbf16>, vector<32x256xbf16>, vector<2x256xf32> -> vector<2x256xf32>
    %101 = arith.index_cast %c2_i32 : i32 to index
    %c0_38 = arith.constant 0 : index
    %102 = vector.load %arg11[%101, %c0_38] : memref<8x256xf32, #tpu.memory_space<vmem>>, vector<1x128xf32>
    %103 = arith.index_cast %98 : i32 to index
    %c128_39 = arith.constant 128 : index
    %104 = vector.load %arg11[%103, %c128_39] : memref<8x256xf32, #tpu.memory_space<vmem>>, vector<1x128xf32>
    %105 = vector.extract_strided_slice %100 {offsets = [0, 0], sizes = [1, 128], strides = [1, 1]} : vector<2x256xf32> to vector<1x128xf32>
    %106 = arith.addf %102, %105 : vector<1x128xf32>
    %107 = vector.extract_strided_slice %100 {offsets = [1, 128], sizes = [1, 128], strides = [1, 1]} : vector<2x256xf32> to vector<1x128xf32>
    %108 = arith.addf %104, %107 : vector<1x128xf32>
    %109 = tpu.concatenate %106, %108 in 0 : vector<1x128xf32>, vector<1x128xf32> -> vector<2x128xf32>
    %110 = vector.extract_strided_slice %109 {offsets = [0, 0], sizes = [2, 96], strides = [1, 1]} : vector<2x128xf32> to vector<2x96xf32>
    %111 = arith.negf %110 : vector<2x96xf32>
    %112 = math.exp %111 : vector<2x96xf32>
    %cst_40 = arith.constant 1.000000e+00 : f32
    %113 = vector.broadcast %cst_40 : f32 to vector<2x96xf32>
    %114 = arith.addf %113, %112 : vector<2x96xf32>
    %115 = arith.divf %113, %114 : vector<2x96xf32>
    %116 = vector.extract_strided_slice %115 {offsets = [0, 0], sizes = [2, 32], strides = [1, 1]} : vector<2x96xf32> to vector<2x32xf32>
    %117 = vector.extract_strided_slice %115 {offsets = [0, 32], sizes = [2, 32], strides = [1, 1]} : vector<2x96xf32> to vector<2x32xf32>
    %118 = vector.extract_strided_slice %115 {offsets = [0, 64], sizes = [2, 32], strides = [1, 1]} : vector<2x96xf32> to vector<2x32xf32>
    %119 = vector.extract_strided_slice %109 {offsets = [0, 96], sizes = [2, 32], strides = [1, 1]} : vector<2x128xf32> to vector<2x32xf32>
    %120 = math.tanh %119 : vector<2x32xf32>
    %121 = arith.mulf %117, %85 : vector<2x32xf32>
    %122 = arith.mulf %116, %120 : vector<2x32xf32>
    %123 = arith.addf %121, %122 : vector<2x32xf32>
    %124 = math.tanh %123 : vector<2x32xf32>
    %125 = arith.mulf %118, %124 : vector<2x32xf32>
    %126 = vector.extract_strided_slice %125 {offsets = [0, 0], sizes = [1, 32], strides = [1, 1]} : vector<2x32xf32> to vector<1x32xf32>
    %c0_41 = arith.constant 0 : index
    %127 = arith.index_cast %c2_i32 : i32 to index
    %c0_42 = arith.constant 0 : index
    %128 = vector.load %arg8[%c0_41, %127, %c0_42] : memref<1x8x64xf32, #tpu.memory_space<vmem>>, vector<1x1x32xf32>
    %129 = vector.shape_cast %128 : vector<1x1x32xf32> to vector<1x32xf32>
    %130 = vector.shape_cast %126 : vector<1x32xf32> to vector<1x1x32xf32>
    tpu.vector_store %arg8[%c0_41, %127, %c0_42], %130 {strides = array<i32>} : memref<1x8x64xf32, #tpu.memory_space<vmem>>, vector<1x1x32xf32>,
    %131 = vector.extract_strided_slice %125 {offsets = [1, 0], sizes = [1, 32], strides = [1, 1]} : vector<2x32xf32> to vector<1x32xf32>
    %c0_43 = arith.constant 0 : index
    %132 = arith.index_cast %98 : i32 to index
    %c32_44 = arith.constant 32 : index
    %133 = vector.load %arg8[%c0_43, %132, %c32_44] : memref<1x8x64xf32, #tpu.memory_space<vmem>>, vector<1x1x32xf32>
    %134 = vector.shape_cast %133 : vector<1x1x32xf32> to vector<1x32xf32>
    %135 = vector.shape_cast %131 : vector<1x32xf32> to vector<1x1x32xf32>
    tpu.vector_store %arg8[%c0_43, %132, %c32_44], %135 {strides = array<i32>} : memref<1x8x64xf32, #tpu.memory_space<vmem>>, vector<1x1x32xf32>,
    %c3_i32 = arith.constant 3 : i32
    %c7_i32_45 = arith.constant 7 : i32
    %136 = arith.subi %c7_i32_45, %c3_i32 : i32
    %137 = arith.truncf %125 : vector<2x32xf32> to vector<2x32xbf16>
    %cst_46 = arith.constant dense<0.000000e+00> : vector<2x256xf32>
    %138 = tpu.matmul %137, %20, %cst_46 {dimension_numbers = #tpu.dot_dimension_numbers<[1], [0], [0], [1], [0, 0, 1, 1], [], []>} : vector<2x32xbf16>, vector<32x256xbf16>, vector<2x256xf32> -> vector<2x256xf32>
    %139 = arith.index_cast %c3_i32 : i32 to index
    %c0_47 = arith.constant 0 : index
    %140 = vector.load %arg11[%139, %c0_47] : memref<8x256xf32, #tpu.memory_space<vmem>>, vector<1x128xf32>
    %141 = arith.index_cast %136 : i32 to index
    %c128_48 = arith.constant 128 : index
    %142 = vector.load %arg11[%141, %c128_48] : memref<8x256xf32, #tpu.memory_space<vmem>>, vector<1x128xf32>
    %143 = vector.extract_strided_slice %138 {offsets = [0, 0], sizes = [1, 128], strides = [1, 1]} : vector<2x256xf32> to vector<1x128xf32>
    %144 = arith.addf %140, %143 : vector<1x128xf32>
    %145 = vector.extract_strided_slice %138 {offsets = [1, 128], sizes = [1, 128], strides = [1, 1]} : vector<2x256xf32> to vector<1x128xf32>
    %146 = arith.addf %142, %145 : vector<1x128xf32>
    %147 = tpu.concatenate %144, %146 in 0 : vector<1x128xf32>, vector<1x128xf32> -> vector<2x128xf32>
    %148 = vector.extract_strided_slice %147 {offsets = [0, 0], sizes = [2, 96], strides = [1, 1]} : vector<2x128xf32> to vector<2x96xf32>
    %149 = arith.negf %148 : vector<2x96xf32>
    %150 = math.exp %149 : vector<2x96xf32>
    %cst_49 = arith.constant 1.000000e+00 : f32
    %151 = vector.broadcast %cst_49 : f32 to vector<2x96xf32>
    %152 = arith.addf %151, %150 : vector<2x96xf32>
    %153 = arith.divf %151, %152 : vector<2x96xf32>
    %154 = vector.extract_strided_slice %153 {offsets = [0, 0], sizes = [2, 32], strides = [1, 1]} : vector<2x96xf32> to vector<2x32xf32>
    %155 = vector.extract_strided_slice %153 {offsets = [0, 32], sizes = [2, 32], strides = [1, 1]} : vector<2x96xf32> to vector<2x32xf32>
    %156 = vector.extract_strided_slice %153 {offsets = [0, 64], sizes = [2, 32], strides = [1, 1]} : vector<2x96xf32> to vector<2x32xf32>
    %157 = vector.extract_strided_slice %147 {offsets = [0, 96], sizes = [2, 32], strides = [1, 1]} : vector<2x128xf32> to vector<2x32xf32>
    %158 = math.tanh %157 : vector<2x32xf32>
    %159 = arith.mulf %155, %123 : vector<2x32xf32>
    %160 = arith.mulf %154, %158 : vector<2x32xf32>
    %161 = arith.addf %159, %160 : vector<2x32xf32>
    %162 = math.tanh %161 : vector<2x32xf32>
    %163 = arith.mulf %156, %162 : vector<2x32xf32>
    %164 = vector.extract_strided_slice %163 {offsets = [0, 0], sizes = [1, 32], strides = [1, 1]} : vector<2x32xf32> to vector<1x32xf32>
    %c0_50 = arith.constant 0 : index
    %165 = arith.index_cast %c3_i32 : i32 to index
    %c0_51 = arith.constant 0 : index
    %166 = vector.load %arg8[%c0_50, %165, %c0_51] : memref<1x8x64xf32, #tpu.memory_space<vmem>>, vector<1x1x32xf32>
    %167 = vector.shape_cast %166 : vector<1x1x32xf32> to vector<1x32xf32>
    %168 = vector.shape_cast %164 : vector<1x32xf32> to vector<1x1x32xf32>
    tpu.vector_store %arg8[%c0_50, %165, %c0_51], %168 {strides = array<i32>} : memref<1x8x64xf32, #tpu.memory_space<vmem>>, vector<1x1x32xf32>,
    %169 = vector.extract_strided_slice %163 {offsets = [1, 0], sizes = [1, 32], strides = [1, 1]} : vector<2x32xf32> to vector<1x32xf32>
    %c0_52 = arith.constant 0 : index
    %170 = arith.index_cast %136 : i32 to index
    %c32_53 = arith.constant 32 : index
    %171 = vector.load %arg8[%c0_52, %170, %c32_53] : memref<1x8x64xf32, #tpu.memory_space<vmem>>, vector<1x1x32xf32>
    %172 = vector.shape_cast %171 : vector<1x1x32xf32> to vector<1x32xf32>
    %173 = vector.shape_cast %169 : vector<1x32xf32> to vector<1x1x32xf32>
    tpu.vector_store %arg8[%c0_52, %170, %c32_53], %173 {strides = array<i32>} : memref<1x8x64xf32, #tpu.memory_space<vmem>>, vector<1x1x32xf32>,
    %c4_i32 = arith.constant 4 : i32
    %c7_i32_54 = arith.constant 7 : i32
    %174 = arith.subi %c7_i32_54, %c4_i32 : i32
    %175 = arith.truncf %163 : vector<2x32xf32> to vector<2x32xbf16>
    %cst_55 = arith.constant dense<0.000000e+00> : vector<2x256xf32>
    %176 = tpu.matmul %175, %20, %cst_55 {dimension_numbers = #tpu.dot_dimension_numbers<[1], [0], [0], [1], [0, 0, 1, 1], [], []>} : vector<2x32xbf16>, vector<32x256xbf16>, vector<2x256xf32> -> vector<2x256xf32>
    %177 = arith.index_cast %c4_i32 : i32 to index
    %c0_56 = arith.constant 0 : index
    %178 = vector.load %arg11[%177, %c0_56] : memref<8x256xf32, #tpu.memory_space<vmem>>, vector<1x128xf32>
    %179 = arith.index_cast %174 : i32 to index
    %c128_57 = arith.constant 128 : index
    %180 = vector.load %arg11[%179, %c128_57] : memref<8x256xf32, #tpu.memory_space<vmem>>, vector<1x128xf32>
    %181 = vector.extract_strided_slice %176 {offsets = [0, 0], sizes = [1, 128], strides = [1, 1]} : vector<2x256xf32> to vector<1x128xf32>
    %182 = arith.addf %178, %181 : vector<1x128xf32>
    %183 = vector.extract_strided_slice %176 {offsets = [1, 128], sizes = [1, 128], strides = [1, 1]} : vector<2x256xf32> to vector<1x128xf32>
    %184 = arith.addf %180, %183 : vector<1x128xf32>
    %185 = tpu.concatenate %182, %184 in 0 : vector<1x128xf32>, vector<1x128xf32> -> vector<2x128xf32>
    %186 = vector.extract_strided_slice %185 {offsets = [0, 0], sizes = [2, 96], strides = [1, 1]} : vector<2x128xf32> to vector<2x96xf32>
    %187 = arith.negf %186 : vector<2x96xf32>
    %188 = math.exp %187 : vector<2x96xf32>
    %cst_58 = arith.constant 1.000000e+00 : f32
    %189 = vector.broadcast %cst_58 : f32 to vector<2x96xf32>
    %190 = arith.addf %189, %188 : vector<2x96xf32>
    %191 = arith.divf %189, %190 : vector<2x96xf32>
    %192 = vector.extract_strided_slice %191 {offsets = [0, 0], sizes = [2, 32], strides = [1, 1]} : vector<2x96xf32> to vector<2x32xf32>
    %193 = vector.extract_strided_slice %191 {offsets = [0, 32], sizes = [2, 32], strides = [1, 1]} : vector<2x96xf32> to vector<2x32xf32>
    %194 = vector.extract_strided_slice %191 {offsets = [0, 64], sizes = [2, 32], strides = [1, 1]} : vector<2x96xf32> to vector<2x32xf32>
    %195 = vector.extract_strided_slice %185 {offsets = [0, 96], sizes = [2, 32], strides = [1, 1]} : vector<2x128xf32> to vector<2x32xf32>
    %196 = math.tanh %195 : vector<2x32xf32>
    %197 = arith.mulf %193, %161 : vector<2x32xf32>
    %198 = arith.mulf %192, %196 : vector<2x32xf32>
    %199 = arith.addf %197, %198 : vector<2x32xf32>
    %200 = math.tanh %199 : vector<2x32xf32>
    %201 = arith.mulf %194, %200 : vector<2x32xf32>
    %202 = vector.extract_strided_slice %201 {offsets = [0, 0], sizes = [1, 32], strides = [1, 1]} : vector<2x32xf32> to vector<1x32xf32>
    %c0_59 = arith.constant 0 : index
    %203 = arith.index_cast %c4_i32 : i32 to index
    %c0_60 = arith.constant 0 : index
    %204 = vector.load %arg8[%c0_59, %203, %c0_60] : memref<1x8x64xf32, #tpu.memory_space<vmem>>, vector<1x1x32xf32>
    %205 = vector.shape_cast %204 : vector<1x1x32xf32> to vector<1x32xf32>
    %206 = vector.shape_cast %202 : vector<1x32xf32> to vector<1x1x32xf32>
    tpu.vector_store %arg8[%c0_59, %203, %c0_60], %206 {strides = array<i32>} : memref<1x8x64xf32, #tpu.memory_space<vmem>>, vector<1x1x32xf32>,
    %207 = vector.extract_strided_slice %201 {offsets = [1, 0], sizes = [1, 32], strides = [1, 1]} : vector<2x32xf32> to vector<1x32xf32>
    %c0_61 = arith.constant 0 : index
    %208 = arith.index_cast %174 : i32 to index
    %c32_62 = arith.constant 32 : index
    %209 = vector.load %arg8[%c0_61, %208, %c32_62] : memref<1x8x64xf32, #tpu.memory_space<vmem>>, vector<1x1x32xf32>
    %210 = vector.shape_cast %209 : vector<1x1x32xf32> to vector<1x32xf32>
    %211 = vector.shape_cast %207 : vector<1x32xf32> to vector<1x1x32xf32>
    tpu.vector_store %arg8[%c0_61, %208, %c32_62], %211 {strides = array<i32>} : memref<1x8x64xf32, #tpu.memory_space<vmem>>, vector<1x1x32xf32>,
    %c5_i32 = arith.constant 5 : i32
    %c7_i32_63 = arith.constant 7 : i32
    %212 = arith.subi %c7_i32_63, %c5_i32 : i32
    %213 = arith.truncf %201 : vector<2x32xf32> to vector<2x32xbf16>
    %cst_64 = arith.constant dense<0.000000e+00> : vector<2x256xf32>
    %214 = tpu.matmul %213, %20, %cst_64 {dimension_numbers = #tpu.dot_dimension_numbers<[1], [0], [0], [1], [0, 0, 1, 1], [], []>} : vector<2x32xbf16>, vector<32x256xbf16>, vector<2x256xf32> -> vector<2x256xf32>
    %215 = arith.index_cast %c5_i32 : i32 to index
    %c0_65 = arith.constant 0 : index
    %216 = vector.load %arg11[%215, %c0_65] : memref<8x256xf32, #tpu.memory_space<vmem>>, vector<1x128xf32>
    %217 = arith.index_cast %212 : i32 to index
    %c128_66 = arith.constant 128 : index
    %218 = vector.load %arg11[%217, %c128_66] : memref<8x256xf32, #tpu.memory_space<vmem>>, vector<1x128xf32>
    %219 = vector.extract_strided_slice %214 {offsets = [0, 0], sizes = [1, 128], strides = [1, 1]} : vector<2x256xf32> to vector<1x128xf32>
    %220 = arith.addf %216, %219 : vector<1x128xf32>
    %221 = vector.extract_strided_slice %214 {offsets = [1, 128], sizes = [1, 128], strides = [1, 1]} : vector<2x256xf32> to vector<1x128xf32>
    %222 = arith.addf %218, %221 : vector<1x128xf32>
    %223 = tpu.concatenate %220, %222 in 0 : vector<1x128xf32>, vector<1x128xf32> -> vector<2x128xf32>
    %224 = vector.extract_strided_slice %223 {offsets = [0, 0], sizes = [2, 96], strides = [1, 1]} : vector<2x128xf32> to vector<2x96xf32>
    %225 = arith.negf %224 : vector<2x96xf32>
    %226 = math.exp %225 : vector<2x96xf32>
    %cst_67 = arith.constant 1.000000e+00 : f32
    %227 = vector.broadcast %cst_67 : f32 to vector<2x96xf32>
    %228 = arith.addf %227, %226 : vector<2x96xf32>
    %229 = arith.divf %227, %228 : vector<2x96xf32>
    %230 = vector.extract_strided_slice %229 {offsets = [0, 0], sizes = [2, 32], strides = [1, 1]} : vector<2x96xf32> to vector<2x32xf32>
    %231 = vector.extract_strided_slice %229 {offsets = [0, 32], sizes = [2, 32], strides = [1, 1]} : vector<2x96xf32> to vector<2x32xf32>
    %232 = vector.extract_strided_slice %229 {offsets = [0, 64], sizes = [2, 32], strides = [1, 1]} : vector<2x96xf32> to vector<2x32xf32>
    %233 = vector.extract_strided_slice %223 {offsets = [0, 96], sizes = [2, 32], strides = [1, 1]} : vector<2x128xf32> to vector<2x32xf32>
    %234 = math.tanh %233 : vector<2x32xf32>
    %235 = arith.mulf %231, %199 : vector<2x32xf32>
    %236 = arith.mulf %230, %234 : vector<2x32xf32>
    %237 = arith.addf %235, %236 : vector<2x32xf32>
    %238 = math.tanh %237 : vector<2x32xf32>
    %239 = arith.mulf %232, %238 : vector<2x32xf32>
    %240 = vector.extract_strided_slice %239 {offsets = [0, 0], sizes = [1, 32], strides = [1, 1]} : vector<2x32xf32> to vector<1x32xf32>
    %c0_68 = arith.constant 0 : index
    %241 = arith.index_cast %c5_i32 : i32 to index
    %c0_69 = arith.constant 0 : index
    %242 = vector.load %arg8[%c0_68, %241, %c0_69] : memref<1x8x64xf32, #tpu.memory_space<vmem>>, vector<1x1x32xf32>
    %243 = vector.shape_cast %242 : vector<1x1x32xf32> to vector<1x32xf32>
    %244 = vector.shape_cast %240 : vector<1x32xf32> to vector<1x1x32xf32>
    tpu.vector_store %arg8[%c0_68, %241, %c0_69], %244 {strides = array<i32>} : memref<1x8x64xf32, #tpu.memory_space<vmem>>, vector<1x1x32xf32>,
    %245 = vector.extract_strided_slice %239 {offsets = [1, 0], sizes = [1, 32], strides = [1, 1]} : vector<2x32xf32> to vector<1x32xf32>
    %c0_70 = arith.constant 0 : index
    %246 = arith.index_cast %212 : i32 to index
    %c32_71 = arith.constant 32 : index
    %247 = vector.load %arg8[%c0_70, %246, %c32_71] : memref<1x8x64xf32, #tpu.memory_space<vmem>>, vector<1x1x32xf32>
    %248 = vector.shape_cast %247 : vector<1x1x32xf32> to vector<1x32xf32>
    %249 = vector.shape_cast %245 : vector<1x32xf32> to vector<1x1x32xf32>
    tpu.vector_store %arg8[%c0_70, %246, %c32_71], %249 {strides = array<i32>} : memref<1x8x64xf32, #tpu.memory_space<vmem>>, vector<1x1x32xf32>,
    %c6_i32 = arith.constant 6 : i32
    %c7_i32_72 = arith.constant 7 : i32
    %250 = arith.subi %c7_i32_72, %c6_i32 : i32
    %251 = arith.truncf %239 : vector<2x32xf32> to vector<2x32xbf16>
    %cst_73 = arith.constant dense<0.000000e+00> : vector<2x256xf32>
    %252 = tpu.matmul %251, %20, %cst_73 {dimension_numbers = #tpu.dot_dimension_numbers<[1], [0], [0], [1], [0, 0, 1, 1], [], []>} : vector<2x32xbf16>, vector<32x256xbf16>, vector<2x256xf32> -> vector<2x256xf32>
    %253 = arith.index_cast %c6_i32 : i32 to index
    %c0_74 = arith.constant 0 : index
    %254 = vector.load %arg11[%253, %c0_74] : memref<8x256xf32, #tpu.memory_space<vmem>>, vector<1x128xf32>
    %255 = arith.index_cast %250 : i32 to index
    %c128_75 = arith.constant 128 : index
    %256 = vector.load %arg11[%255, %c128_75] : memref<8x256xf32, #tpu.memory_space<vmem>>, vector<1x128xf32>
    %257 = vector.extract_strided_slice %252 {offsets = [0, 0], sizes = [1, 128], strides = [1, 1]} : vector<2x256xf32> to vector<1x128xf32>
    %258 = arith.addf %254, %257 : vector<1x128xf32>
    %259 = vector.extract_strided_slice %252 {offsets = [1, 128], sizes = [1, 128], strides = [1, 1]} : vector<2x256xf32> to vector<1x128xf32>
    %260 = arith.addf %256, %259 : vector<1x128xf32>
    %261 = tpu.concatenate %258, %260 in 0 : vector<1x128xf32>, vector<1x128xf32> -> vector<2x128xf32>
    %262 = vector.extract_strided_slice %261 {offsets = [0, 0], sizes = [2, 96], strides = [1, 1]} : vector<2x128xf32> to vector<2x96xf32>
    %263 = arith.negf %262 : vector<2x96xf32>
    %264 = math.exp %263 : vector<2x96xf32>
    %cst_76 = arith.constant 1.000000e+00 : f32
    %265 = vector.broadcast %cst_76 : f32 to vector<2x96xf32>
    %266 = arith.addf %265, %264 : vector<2x96xf32>
    %267 = arith.divf %265, %266 : vector<2x96xf32>
    %268 = vector.extract_strided_slice %267 {offsets = [0, 0], sizes = [2, 32], strides = [1, 1]} : vector<2x96xf32> to vector<2x32xf32>
    %269 = vector.extract_strided_slice %267 {offsets = [0, 32], sizes = [2, 32], strides = [1, 1]} : vector<2x96xf32> to vector<2x32xf32>
    %270 = vector.extract_strided_slice %267 {offsets = [0, 64], sizes = [2, 32], strides = [1, 1]} : vector<2x96xf32> to vector<2x32xf32>
    %271 = vector.extract_strided_slice %261 {offsets = [0, 96], sizes = [2, 32], strides = [1, 1]} : vector<2x128xf32> to vector<2x32xf32>
    %272 = math.tanh %271 : vector<2x32xf32>
    %273 = arith.mulf %269, %237 : vector<2x32xf32>
    %274 = arith.mulf %268, %272 : vector<2x32xf32>
    %275 = arith.addf %273, %274 : vector<2x32xf32>
    %276 = math.tanh %275 : vector<2x32xf32>
    %277 = arith.mulf %270, %276 : vector<2x32xf32>
    %278 = vector.extract_strided_slice %277 {offsets = [0, 0], sizes = [1, 32], strides = [1, 1]} : vector<2x32xf32> to vector<1x32xf32>
    %c0_77 = arith.constant 0 : index
    %279 = arith.index_cast %c6_i32 : i32 to index
    %c0_78 = arith.constant 0 : index
    %280 = vector.load %arg8[%c0_77, %279, %c0_78] : memref<1x8x64xf32, #tpu.memory_space<vmem>>, vector<1x1x32xf32>
    %281 = vector.shape_cast %280 : vector<1x1x32xf32> to vector<1x32xf32>
    %282 = vector.shape_cast %278 : vector<1x32xf32> to vector<1x1x32xf32>
    tpu.vector_store %arg8[%c0_77, %279, %c0_78], %282 {strides = array<i32>} : memref<1x8x64xf32, #tpu.memory_space<vmem>>, vector<1x1x32xf32>,
    %283 = vector.extract_strided_slice %277 {offsets = [1, 0], sizes = [1, 32], strides = [1, 1]} : vector<2x32xf32> to vector<1x32xf32>
    %c0_79 = arith.constant 0 : index
    %284 = arith.index_cast %250 : i32 to index
    %c32_80 = arith.constant 32 : index
    %285 = vector.load %arg8[%c0_79, %284, %c32_80] : memref<1x8x64xf32, #tpu.memory_space<vmem>>, vector<1x1x32xf32>
    %286 = vector.shape_cast %285 : vector<1x1x32xf32> to vector<1x32xf32>
    %287 = vector.shape_cast %283 : vector<1x32xf32> to vector<1x1x32xf32>
    tpu.vector_store %arg8[%c0_79, %284, %c32_80], %287 {strides = array<i32>} : memref<1x8x64xf32, #tpu.memory_space<vmem>>, vector<1x1x32xf32>,
    %c7_i32_81 = arith.constant 7 : i32
    %c7_i32_82 = arith.constant 7 : i32
    %288 = arith.subi %c7_i32_82, %c7_i32_81 : i32
    %289 = arith.truncf %277 : vector<2x32xf32> to vector<2x32xbf16>
    %cst_83 = arith.constant dense<0.000000e+00> : vector<2x256xf32>
    %290 = tpu.matmul %289, %20, %cst_83 {dimension_numbers = #tpu.dot_dimension_numbers<[1], [0], [0], [1], [0, 0, 1, 1], [], []>} : vector<2x32xbf16>, vector<32x256xbf16>, vector<2x256xf32> -> vector<2x256xf32>
    %291 = arith.index_cast %c7_i32_81 : i32 to index
    %c0_84 = arith.constant 0 : index
    %292 = vector.load %arg11[%291, %c0_84] : memref<8x256xf32, #tpu.memory_space<vmem>>, vector<1x128xf32>
    %293 = arith.index_cast %288 : i32 to index
    %c128_85 = arith.constant 128 : index
    %294 = vector.load %arg11[%293, %c128_85] : memref<8x256xf32, #tpu.memory_space<vmem>>, vector<1x128xf32>
    %295 = vector.extract_strided_slice %290 {offsets = [0, 0], sizes = [1, 128], strides = [1, 1]} : vector<2x256xf32> to vector<1x128xf32>
    %296 = arith.addf %292, %295 : vector<1x128xf32>
    %297 = vector.extract_strided_slice %290 {offsets = [1, 128], sizes = [1, 128], strides = [1, 1]} : vector<2x256xf32> to vector<1x128xf32>
    %298 = arith.addf %294, %297 : vector<1x128xf32>
    %299 = tpu.concatenate %296, %298 in 0 : vector<1x128xf32>, vector<1x128xf32> -> vector<2x128xf32>
    %300 = vector.extract_strided_slice %299 {offsets = [0, 0], sizes = [2, 96], strides = [1, 1]} : vector<2x128xf32> to vector<2x96xf32>
    %301 = arith.negf %300 : vector<2x96xf32>
    %302 = math.exp %301 : vector<2x96xf32>
    %cst_86 = arith.constant 1.000000e+00 : f32
    %303 = vector.broadcast %cst_86 : f32 to vector<2x96xf32>
    %304 = arith.addf %303, %302 : vector<2x96xf32>
    %305 = arith.divf %303, %304 : vector<2x96xf32>
    %306 = vector.extract_strided_slice %305 {offsets = [0, 0], sizes = [2, 32], strides = [1, 1]} : vector<2x96xf32> to vector<2x32xf32>
    %307 = vector.extract_strided_slice %305 {offsets = [0, 32], sizes = [2, 32], strides = [1, 1]} : vector<2x96xf32> to vector<2x32xf32>
    %308 = vector.extract_strided_slice %305 {offsets = [0, 64], sizes = [2, 32], strides = [1, 1]} : vector<2x96xf32> to vector<2x32xf32>
    %309 = vector.extract_strided_slice %299 {offsets = [0, 96], sizes = [2, 32], strides = [1, 1]} : vector<2x128xf32> to vector<2x32xf32>
    %310 = math.tanh %309 : vector<2x32xf32>
    %311 = arith.mulf %307, %275 : vector<2x32xf32>
    %312 = arith.mulf %306, %310 : vector<2x32xf32>
    %313 = arith.addf %311, %312 : vector<2x32xf32>
    %314 = math.tanh %313 : vector<2x32xf32>
    %315 = arith.mulf %308, %314 : vector<2x32xf32>
    %316 = vector.extract_strided_slice %315 {offsets = [0, 0], sizes = [1, 32], strides = [1, 1]} : vector<2x32xf32> to vector<1x32xf32>
    %c0_87 = arith.constant 0 : index
    %317 = arith.index_cast %c7_i32_81 : i32 to index
    %c0_88 = arith.constant 0 : index
    %318 = vector.load %arg8[%c0_87, %317, %c0_88] : memref<1x8x64xf32, #tpu.memory_space<vmem>>, vector<1x1x32xf32>
    %319 = vector.shape_cast %318 : vector<1x1x32xf32> to vector<1x32xf32>
    %320 = vector.shape_cast %316 : vector<1x32xf32> to vector<1x1x32xf32>
    tpu.vector_store %arg8[%c0_87, %317, %c0_88], %320 {strides = array<i32>} : memref<1x8x64xf32, #tpu.memory_space<vmem>>, vector<1x1x32xf32>,
    %321 = vector.extract_strided_slice %315 {offsets = [1, 0], sizes = [1, 32], strides = [1, 1]} : vector<2x32xf32> to vector<1x32xf32>
    %c0_89 = arith.constant 0 : index
    %322 = arith.index_cast %288 : i32 to index
    %c32_90 = arith.constant 32 : index
    %323 = vector.load %arg8[%c0_89, %322, %c32_90] : memref<1x8x64xf32, #tpu.memory_space<vmem>>, vector<1x1x32xf32>
    %324 = vector.shape_cast %323 : vector<1x1x32xf32> to vector<1x32xf32>
    %325 = vector.shape_cast %321 : vector<1x32xf32> to vector<1x1x32xf32>
    tpu.vector_store %arg8[%c0_89, %322, %c32_90], %325 {strides = array<i32>} : memref<1x8x64xf32, #tpu.memory_space<vmem>>, vector<1x1x32xf32>,
    %c8_i32 = arith.constant 8 : i32
    %c0_91 = arith.constant 0 : index
    %c0_92 = arith.constant 0 : index
    %c0_93 = arith.constant 0 : index
    %326 = vector.load %arg9[%c0_91, %c0_92, %c0_93] : memref<1x2x32xf32, #tpu.memory_space<vmem>>, vector<1x2x32xf32>
    %327 = vector.shape_cast %326 : vector<1x2x32xf32> to vector<2x32xf32>
    %328 = vector.shape_cast %315 : vector<2x32xf32> to vector<1x2x32xf32>
    tpu.vector_store %arg9[%c0_91, %c0_92, %c0_93], %328 {strides = array<i32>} : memref<1x2x32xf32, #tpu.memory_space<vmem>>, vector<1x2x32xf32>,
    %c0_94 = arith.constant 0 : index
    %c0_95 = arith.constant 0 : index
    %c0_96 = arith.constant 0 : index
    %329 = vector.load %arg10[%c0_94, %c0_95, %c0_96] : memref<1x2x32xf32, #tpu.memory_space<vmem>>, vector<1x2x32xf32>
    %330 = vector.shape_cast %329 : vector<1x2x32xf32> to vector<2x32xf32>
    %331 = vector.shape_cast %313 : vector<2x32xf32> to vector<1x2x32xf32>
    tpu.vector_store %arg10[%c0_94, %c0_95, %c0_96], %331 {strides = array<i32>} : memref<1x2x32xf32, #tpu.memory_space<vmem>>, vector<1x2x32xf32>,
    return
  }
  func.func @transform_0(%arg0: i32) -> (i32, i32, i32) {
    %c0_i32 = arith.constant 0 : i32
    %c0_i32_0 = arith.constant 0 : i32
    %c0_i32_1 = arith.constant 0 : i32
    return %arg0, %c0_i32, %c0_i32_0 : i32, i32, i32
  }
  func.func @transform_1(%arg0: i32) -> (i32, i32, i32) {
    %c0_i32 = arith.constant 0 : i32
    %c0_i32_0 = arith.constant 0 : i32
    %c0_i32_1 = arith.constant 0 : i32
    return %arg0, %c0_i32, %c0_i32_0 : i32, i32, i32
  }
  func.func @transform_2(%arg0: i32) -> (i32, i32) {
    %c0_i32 = arith.constant 0 : i32
    %c0_i32_0 = arith.constant 0 : i32
    %c0_i32_1 = arith.constant 0 : i32
    return %c0_i32, %c0_i32_0 : i32, i32
  }
  func.func @transform_3(%arg0: i32) -> (i32, i32) {
    %c0_i32 = arith.constant 0 : i32
    %c0_i32_0 = arith.constant 0 : i32
    %c0_i32_1 = arith.constant 0 : i32
    return %c0_i32, %c0_i32_0 : i32, i32
  }
  func.func @transform_4(%arg0: i32) -> (i32, i32) {
    %c0_i32 = arith.constant 0 : i32
    %c0_i32_0 = arith.constant 0 : i32
    %c0_i32_1 = arith.constant 0 : i32
    return %c0_i32, %c0_i32_0 : i32, i32
  }
  func.func @transform_5(%arg0: i32) -> (i32, i32) {
    %c0_i32 = arith.constant 0 : i32
    %c0_i32_0 = arith.constant 0 : i32
    %c0_i32_1 = arith.constant 0 : i32
    return %c0_i32, %c0_i32_0 : i32, i32
  }
  func.func @transform_6(%arg0: i32) -> (i32, i32) {
    %c0_i32 = arith.constant 0 : i32
    %c0_i32_0 = arith.constant 0 : i32
    %c0_i32_1 = arith.constant 0 : i32
    return %c0_i32, %c0_i32_0 : i32, i32
  }
  func.func @transform_7(%arg0: i32) -> (i32, i32, i32) {
    %c0_i32 = arith.constant 0 : i32
    %c0_i32_0 = arith.constant 0 : i32
    %c0_i32_1 = arith.constant 0 : i32
    return %arg0, %c0_i32, %c0_i32_0 : i32, i32, i32
  }
  func.func @transform_8(%arg0: i32) -> (i32, i32, i32) {
    %c0_i32 = arith.constant 0 : i32
    %c0_i32_0 = arith.constant 0 : i32
    %c0_i32_1 = arith.constant 0 : i32
    return %arg0, %c0_i32, %c0_i32_0 : i32, i32, i32
  }
  func.func @transform_9(%arg0: i32) -> (i32, i32, i32) {
    %c0_i32 = arith.constant 0 : i32
    %c0_i32_0 = arith.constant 0 : i32
    %c0_i32_1 = arith.constant 0 : i32
    return %arg0, %c0_i32, %c0_i32_0 : i32, i32, i32
  }
}

</mosaic_0001>

<bundles_post_ra>
// kernel: tpu_custom_call.1
= control target key start
LH: loop header
LB: loop body
LE: loop exit
PB: predicated region body
PF: predicated region fallthrough
CT: control target
= control target key end

     0   :  { %s2678_s0 = inlined_call_operand.hbm [shape: bf16[2,8,16], index: 0, kind: input, shape index: {}]   ;;  %s2679_s1 = inlined_call_operand.hbm [shape: bf16[2,8,8], index: 1, kind: input, shape index: {}]   ;;  %s2680_s2 = inlined_call_operand.hbm [shape: bf16[16,32], index: 2, kind: input, shape index: {}]   ;;  %s2681_s3 = inlined_call_operand.vmem [shape: f32[1,32], index: 3, kind: input, shape index: {}]   ;;  %s2682_s4 = inlined_call_operand.hbm [shape: bf16[32,256], index: 4, kind: input, shape index: {}]   ;;  %s2683_s5 = inlined_call_operand.vmem [shape: f32[1,256], index: 5, kind: input, shape index: {}]   ;;  %s2684_s6 = inlined_call_operand.hbm [shape: bf16[32,256], index: 6, kind: input, shape index: {}]   ;;  %s2685_s7 = inlined_call_operand.hbm [shape: f32[2,8,64], index: 7, kind: output, shape index: {0}]   ;;  %s2686_s8 = inlined_call_operand.hbm [shape: f32[2,2,32], index: 8, kind: output, shape index: {1}]   ;;  %s2687_s9 = inlined_call_operand.hbm [shape: f32[2,2,32], index: 9, kind: output, shape index: {2}]  }
   0x1   :  { %2696 = sst [smem:[#allocation25_spill]] %s2680_s2 }
   0x2   :  { %2697 = sst [smem:[#allocation26_spill]] %s2682_s4 }
   0x3   :  { %2698 = sst [smem:[#allocation27_spill]] %s2684_s6 }
   0x4   :  { %15 = vsyncpa [#allocation4], 0 }
   0x5   :  { %17 = vsyncpa [#allocation4 + $0x1], 0 }
   0x6   :  { %18 = vsyncpa [#allocation7], 0 }
   0x7   :  { %20 = vsyncpa [#allocation7 + $0x1], 0 }
   0x8   :  { %21 = vsyncpa [#allocation10], 0 }
   0x9   :  { %22 = vsyncpa [#allocation5], 0 }
   0xa   :  { %24 = vsyncpa [#allocation5 + $0x1], 0 }
   0xb   :  { %25 = vsyncpa [#allocation14], 0 }
   0xc   :  { %27 = vsyncpa [#allocation14 + $0x1], 0  ;;  %s2178_s30 = smov 0   ;;  %s2180_s10 = smov 0  }
   0xd   :  { %s2182_s11 = smov 0   ;;  %s2184_s12 = smov 0  }
   0xe LB: > { %2699 = sst [smem:[#allocation22_spill]] %s2104_s11  ;;  %s2199_s13 = sadd.s32 4294967295, %s2108_s12   ;;  %s2108_s12 = sphi %s2184_s12, %s2722_s12   ;;  %s2104_s11 = sphi %s2182_s11, %s2724_s11   ;;  %s2100_s10 = sphi %s2180_s10, %s2726_s10   ;;  %s2096_s30 = sphi %s2178_s30, %s2725_s30  }
   0xf   : > { %s2689_s14 = sadd.s32 4294967294, %s2108_s12   ;;  %p53_p0 = scmp.ne.s32.totalorder %s2100_s10, %s2096_s30 }
  0x10   : > { %p2688_p1 = scmp.eq.s32.totalorder %s2199_s13, 0  ;;  %p214_p3 = scmp.eq.s32.totalorder %s2689_s14, 1 }
  0x11   : > { %p1593_p5 = scmp.ge.s32.totalorder %s2108_s12, 1  ;;  %p273_p7 = scmp.lt.s32.totalorder %s2108_s12, 3 }
  0x12   : > { %p2210_p4 = por %p2688_p1, %p53_p0  ;;  %p2215_p6 = por %p214_p3, %p53_p0 }
  0x13   : > { %p2220_p8 = pnand %p1593_p5, %p273_p7  ;;  %s2110_s18 = smov [#allocation8]  }
  0x14   : > { %s2700_s15 = scalar_select %p2210_p4, 1, 0 }
  0x15   : > { %s2701_s16 = scalar_select %p2215_p6, 1, 0 }
  0x16   : > { %s2702_s17 = scalar_select %p2220_p8, 1, 0 }
  0x17   : > { %s285_s19 = sshll.u32 %s2110_s18, 4  ;;  %p1685_p9 = pneg %p2220_p8  ;;  %s286_s19 = int_to_ptr.vmem [resolvable:$true] %s285_s19 }
  0x18   : > { %s2111_s21 = smov [#allocation9]   ;;  %s1853_s23 = scalar_lea.vmem %s286_s19, 128 }
  0x19   : > { %p2229_p11 = pnand %p1685_p9, %p2688_p1  ;;  %s301_s22 = sshll.u32 %s2111_s21, 4  ;;  %s302_s22 = int_to_ptr.vmem [resolvable:$true] %s301_s22 }
  0x1a   : > { %p1854_p13 = scmp.ne.s32.totalorder %s286_s19, %s1853_s23  ;;  %p1861_p5 = scmp.lt.s32.totalorder %s286_s19, %s286_s19 }
  0x1b   : > { %p1844_p12 = pneg %p2229_p11  ;;  %p1862_p7 = scmp.lt.s32.totalorder %s1853_s23, %s1853_s23 }
  0x1d   : > { %p1856_p0 = pnand %p1854_p13, %p1844_p12  ;;  %p1863_p10 = por %p1862_p7, %p1861_p5 }
  0x1f   : > { %p1857_p3 = pneg %p1856_p0 }
  0x21   : > { %p1864_p9 = pnand %p1863_p10, %p1857_p3 }
  0x23   : > { %1867 = shalt.err (!%p1864_p9)
}
  0x24   : > { %s2112_s24 = smov 64   ;;  %s2113_s25 = smov 4  }
  0x25   : > { %s2704_s2 = sld [smem:[#allocation25_spill]]  ;;  %s1879_s28 = scalar_lea.vmem %s302_s22, 512 }
  0x26   : > { %p1880_p1 = scmp.ne.s32.totalorder %s302_s22, %s1879_s28  ;;  %p1887_p2 = scmp.lt.s32.totalorder %s302_s22, %s302_s22 }
  0x27   : > { %p1888_p6 = scmp.lt.s32.totalorder %s1879_s28, %s1879_s28 }
  0x28   : > { %p1882_p13 = pnand %p1880_p1, %p1844_p12 }
  0x29   : > { %p1889_p5 = por %p1888_p6, %p1887_p2 }
  0x2a   : > { %p1883_p0 = pneg %p1882_p13 }
  0x2b   : > { %1688 = dma.hbm_to_vmem [thread:$0]  (!%p2229_p11), %s2704_s2, 128, %s286_s19, [#allocation7], %s2112_s24, %s2112_s24, %s2113_s25  }
  0x2c   : > { %p1890_p10 = pnand %p1889_p5, %p1883_p0 }
  0x2e   : > { %1893 = shalt.err (!%p1890_p10)
}
  0x2f   : > { %s2114_s29 = smov 128   ;;  %s2115_s18 = smov 8  }
  0x30   : > { %s2705_s4 = sld [smem:[#allocation26_spill]]  ;;  %s2116_s19 = smov [#allocation11]  }
  0x31   : > { %s317_s24 = sshll.u32 %s2116_s19, 4  ;;  %s2252_s25 = sadd.s32 1, %s2108_s12   ;;  %s318_s24 = int_to_ptr.vmem [resolvable:$true] %s317_s24 }
  0x32   : > { %2706 = sst [smem:[#allocation23_spill]] %s2252_s25  ;;  %s1905_s26 = scalar_lea.vmem %s318_s24, 512 }
  0x33   : > { %p1906_p1 = scmp.ne.s32.totalorder %s318_s24, %s1905_s26  ;;  %p1913_p3 = scmp.lt.s32.totalorder %s318_s24, %s318_s24 }
  0x34   : > { %p1914_p7 = scmp.lt.s32.totalorder %s1905_s26, %s1905_s26 }
  0x35   : > { %p1908_p2 = pnand %p1906_p1, %p1844_p12 }
  0x36   : > { %1691 = dma.hbm_to_vmem [thread:$0]  (!%p2229_p11), %s2705_s4, 512, %s302_s22, [#allocation10], %s2114_s29, %s2114_s29, %s2115_s18  }
  0x37   : > { %p1909_p6 = pneg %p1908_p2  ;;  %p1915_p9 = por %p1914_p7, %p1913_p3 }
  0x39   : > { %p1916_p13 = pnand %p1915_p9, %p1909_p6 }
  0x3b   : > { %1919 = shalt.err (!%p1916_p13)
}
  0x3c   : > { %s2707_s6 = sld [smem:[#allocation27_spill]]  ;;  %s37_s28 = ssub.s32 %s2108_s12, %s2252_s25 }
  0x3d   : > { %s40_s21 = sadd.s32 1, %s2104_s11  ;;  %p38_p12 = scmp.eq.s32.totalorder %s37_s28, 0 }
  0x3e   : > { %p47_p0 = scmp.ne.s32.totalorder %s2104_s11, %s2100_s10  ;;  %p48_p5 = scmp.eq.s32.totalorder %s2108_s12, 0 }
  0x3f   : > { %p1715_p10 = scmp.lt.s32.totalorder %s2108_s12, 2  ;;  %p2709_p2 = scmp.eq.s32.totalorder %s2199_s13, 1 }
  0x40   : > { %s2270_s20 = scalar_select %p38_p12, %s2104_s11, %s40_s21  }
  0x41   : > { %p49_p1 = por %p48_p5, %p47_p0  ;;  %p2274_p6 = por %p2709_p2, %p47_p0 }
  0x42   : > { %1694 = dma.hbm_to_vmem [thread:$0]  (!%p2229_p11), %s2707_s6, 512, %s318_s24, [#allocation10], %s2114_s29, %s2114_s29, %s2115_s18  }
  0x43   : > { %2708 = sst [smem:[#allocation24_spill]] %s2270_s20  ;;  %s331_s19 = sand.u32 1, %s2104_s11  }
  0x44   : > { %s2710_s23 = scalar_select %p2274_p6, 1, 0 }
  0x45   : > { %s1599_s26 = sshll.u32 %s2108_s12, 6  ;;  %s2280_s27 = sshll.u32 %s331_s19, 2 }
  0x46   : > { %s2285_s18 = scalar_lea.hbm %s2678_s0, %s1599_s26  ;;  %s335_s24 = scalar_lea.vmem [#allocation3], %s2280_s27 }
  0x47   : > { %s342_s28 = sshll.u32 %s335_s24, 4  ;;  %p2288_p11 = pnand %p1715_p10, %p49_p1  ;;  %s343_s28 = int_to_ptr.vmem [resolvable:$true] %s342_s28 }
  0x48   : > { %s2295_s4 = scalar_lea.hbm %s2679_s1, %s1599_s26  ;;  %s332_s22 = scalar_lea.sflag [#allocation4], %s331_s19 }
  0x49   : > { %s1920_s29 = scalar_lea.hbm %s2285_s18, 64  ;;  %p1922_p7 = pneg %p2288_p11 }
  0x4a   : > { %p1921_p3 = scmp.ne.s32.totalorder %s2285_s18, %s1920_s29  ;;  %s1925_s20 = scalar_lea.hbm %s2678_s0, 128 }
  0x4b   : > { %p1926_p12 = scmp.lt.s32.totalorder %s2285_s18, %s2678_s0  ;;  %p1927_p0 = scmp.lt.s32.totalorder %s1925_s20, %s1920_s29 }
  0x4c   : > { %p1923_p9 = pnand %p1922_p7, %p1921_p3 }
  0x4d   : > { %p1928_p5 = por %p1927_p0, %p1926_p12 }
  0x4e   : > { %p1924_p13 = pneg %p1923_p9 }
  0x50   : > { %p1929_p10 = pnand %p1928_p5, %p1924_p13 }
  0x52   : > { %1932 = shalt.err (!%p1929_p10)
}
  0x53   : > { %s1933_s2 = scalar_lea.vmem %s343_s28, 64  ;;  %s2117_s14 = smov [#allocation3]  }
  0x54   : > { %p1934_p1 = scmp.ne.s32.totalorder %s343_s28, %s1933_s2  ;;  %s1938_s19 = sshll.u32 %s2117_s14, 4  ;;  %s1939_s19 = int_to_ptr.vmem [resolvable:$false] %s1938_s19 }
  0x55   : > { %s1940_s6 = scalar_lea.vmem %s1939_s19, 128  ;;  %p1941_p9 = scmp.lt.s32.totalorder %s343_s28, %s1939_s19 }
  0x56   : > { %p1936_p2 = pnand %p1934_p1, %p1922_p7  ;;  %p1942_p6 = scmp.lt.s32.totalorder %s1940_s6, %s1933_s2 }
  0x58   : > { %p1937_p3 = pneg %p1936_p2  ;;  %p1943_p4 = por %p1942_p6, %p1941_p9 }
  0x5a   : > { %p1944_p8 = pnand %p1943_p4, %p1937_p3 }
  0x5c   : > { %1947 = shalt.err (!%p1944_p8)
}
  0x5d   : > { %1698 = dma.hbm_to_vmem [thread:$0]  (!%p2288_p11), %s2285_s18, 64, %s343_s28, %s332_s22  }
  0x5e   : > { %s349_s11 = sand.u32 1, %s2108_s12   ;;  %s353_s25 = scalar_lea.vmem [#allocation6], %s2280_s27 }
  0x5f   : > { %s360_s20 = sshll.u32 %s353_s25, 4  ;;  %s350_s26 = scalar_lea.sflag [#allocation7], %s349_s11  ;;  %s361_s20 = int_to_ptr.vmem [resolvable:$true] %s360_s20 }
  0x60   : > { %s1948_s29 = scalar_lea.hbm %s2295_s4, 64  ;;  %s1953_s14 = scalar_lea.hbm %s2679_s1, 128 }
  0x61   : > { %p1949_p13 = scmp.ne.s32.totalorder %s2295_s4, %s1948_s29  ;;  %p1954_p6 = scmp.lt.s32.totalorder %s2295_s4, %s2679_s1 }
  0x62   : > { %p1955_p12 = scmp.lt.s32.totalorder %s1953_s14, %s1948_s29 }
  0x63   : > { %p1951_p4 = pnand %p1949_p13, %p1922_p7 }
  0x64   : > { %p1956_p0 = por %p1955_p12, %p1954_p6 }
  0x65   : > { %p1952_p8 = pneg %p1951_p4 }
  0x67   : > { %p1957_p5 = pnand %p1956_p0, %p1952_p8 }
  0x69   : > { %1960 = shalt.err (!%p1957_p5)
}
  0x6a   : > { %s1961_s27 = scalar_lea.vmem %s361_s20, 64  ;;  %s2118_s18 = smov [#allocation6]  }
  0x6b   : > { %p1962_p10 = scmp.ne.s32.totalorder %s361_s20, %s1961_s27  ;;  %s1966_s28 = sshll.u32 %s2118_s18, 4  ;;  %s1967_s28 = int_to_ptr.vmem [resolvable:$false] %s1966_s28 }
  0x6c   : > { %s1968_s22 = scalar_lea.vmem %s1967_s28, 128  ;;  %p1969_p3 = scmp.lt.s32.totalorder %s361_s20, %s1967_s28 }
  0x6d   : > { %p1964_p1 = pnand %p1962_p10, %p1922_p7  ;;  %p1970_p9 = scmp.lt.s32.totalorder %s1968_s22, %s1961_s27 }
  0x6f   : > { %p1965_p2 = pneg %p1964_p1  ;;  %p1971_p13 = por %p1970_p9, %p1969_p3 }
  0x71   : > { %p1972_p4 = pnand %p1971_p13, %p1965_p2 }
  0x73   : > { %1975 = shalt.err (!%p1972_p4)
}
  0x74   : > { %1701 = dma.hbm_to_vmem [thread:$0]  (!%p2288_p11), %s2295_s4, 64, %s361_s20, %s350_s26  }
  0x75   : > { %p2712_p8 = scmp.ne.s32.totalorder %s2702_s17, 0 }
  0x76   : > { %s2340_s11 = sand.u32 (!%p2712_p8), 1, %s2100_s10   ;;  %p2713_p7 = scmp.ne.s32.totalorder (!%p2712_p8), %s2700_s15, 0 }
  0x77   : > { %369 = sbr.rel (%p2712_p8) target bundleno = 6158 (0x180e), region = 48  ;;  %s1603_s25 = sshll.u32 (!%p2712_p8), %s2340_s11, 2 }
  0x78   : > { %s372_s29 = scalar_lea.sflag (!%p2712_p8), [#allocation4], %s2340_s11  ;;  %s375_s24 = scalar_lea.vmem (!%p2712_p8), [#allocation3], %s1603_s25 }
  0x7c   : > { %2071 = dma.done.wait (%p2713_p7), %s372_s29, 64  }
  0x7d   : > { %2073 = vsyncadd (%p2713_p7), %s372_s29, 4294967232  ;;  %s380_s4 = sand.u32 1, %s2199_s13   ;;  %s384_s21 = scalar_lea.vmem [#allocation6], %s1603_s25 }
  0x7e   : > { %s381_s17 = scalar_lea.sflag [#allocation7], %s380_s4 }
  0x7f   : > { %2075 = dma.done.wait (%p2713_p7), %s381_s17, 64  }
  0x80   : > { %2077 = vsyncadd (%p2713_p7), %s381_s17, 4294967232  ;;  %p2714_p11 = scmp.eq.s32.totalorder %s2199_s13, 0 }
  0x82   : > { %2079 = dma.done.wait (%p2714_p11), [#allocation7], 128   ;;  %p2715_p6 = pmov %p2714_p11 }
  0x84   : > { %2081 = vsyncadd (%p2715_p6), [#allocation7], 4294967168  ;;  %p2716_p12 = pmov %p2715_p6 }
  0x85   : > { %p2717_p0 = pmov %p2715_p6 }
  0x86   : > { %2083 = dma.done.wait (%p2716_p12), [#allocation10], 1024  }
  0x87   : > { %2085 = vsyncadd (%p2717_p0), [#allocation10], 4294966272  ;;  %v2119_v0 = vmov 0.0   ;;  %vm2120_vm0 = vmmov 0   ;;  %vm455_vm1 = vcmask 1043456   ;;  %vm451_vm2 = vcmask 64512  }
  0x88   : > { %1651 = vmatprep.subr.bf16.mxu0 %v2119_v0  ;;  %1653 = vmatprep.mubr.msk.bf16.mxu0 %vm2120_vm0, %v2119_v0  ;;  %v447_v1 = vld [vmem:[%s375_s24] sm:$0xf]  ;;  %v448_v2 = vld [vmem:[%s384_s21] sm:$0xf]  ;;  %v1765_v4 = vld [vmem:[#allocation8] sm:$0xff]   ;;  %vm513_vm3 = vcmask 130048   ;;  %v565_v31 = vlaneseq }
  0x89   : > { %1657 = vmatprep.subr.bf16.mxu1 %v2119_v0  ;;  %1659 = vmatprep.mubr.msk.bf16.mxu1 %vm2120_vm0, %v2119_v0  ;;  %v457_v3 = vsel %vm455_vm1, %v447_v1, 0  ;;  %v1766_v5 = vld [vmem:[#allocation9 + $0x10] ss:$8 sps:$4 sm:$0xff]   ;;  %v1768_v6 = vld [vmem:[#allocation9 + $0x14] ss:$8 sps:$4 sm:$0xff]   ;;  %v2121_v17 = vmov 0  }
  0x8a   : > { %1652 = vmatpush3.bf16.msra.mxu0 %v457_v3  ;;  %1658 = vmatpush3.bf16.msra.mxu1 %v1765_v4  ;;  %v1771_v12 = vld [vmem:[#allocation9 + $0x4] ss:$8 sps:$4 sm:$0xff]   ;;  %v2363_v13 = vld [vmem:[#allocation11 + $0x14] ss:$8 sps:$4 sm:$0xff]   ;;  %v1769_v14 = vld [vmem:[#allocation9] ss:$8 sps:$4 sm:$0xff]  }
  0x8b   : > { %611 = vmatprep.subr.bf16.mxu0 %v1768_v6  ;;  %v2365_v15 = vld [vmem:[#allocation11 + $0x10] ss:$8 sps:$4 sm:$0xff]   ;;  %681 = vmatprep.subr.bf16.mxu1 %v2363_v13  ;;  %v2369_v16 = vld [vmem:[#allocation11 + $0x4] ss:$8 sps:$4 sm:$0xff]   ;;  %v2373_v18 = vld [vmem:[#allocation11] ss:$8 sps:$4 sm:$0xff]  }
  0x8c   : > { %v1612_v19 = vld [vmem:[%s2681_s3] ss:$0 sm:$0xff]  ;;  %vm595_vm4 = vcmask 261120   ;;  %v566_v32 = vshrl.u32 %v565_v31, 7  ;;  %vm714_vm5 = vcmask 1040384   ;;  %s2122_s14 = smov 32  }
  0x8d   : > { %1654 = vmatmul.mubr.msk.bf16.vlgmr.msra.gmra.mxu0 %vm451_vm2, %v448_v2  ;;  %v563_v34 = vld [vmem:[%s2683_s5] sm:$0x3]  ;;  %s2123_s19 = smov 64   ;;  %s2124_s6 = smov 96   ;;  %vm744_vm6 = vcmask 253952   ;;  %vm749_vm7 = vcmask 517377  }
  0x8e   : > { %612 = vmatpush1.bf16.msra.mxu0 %v1766_v5  ;;  %631 = vmatprep.mubr.bf16.mxu0 %v2121_v17  ;;  %v567_v33 = vsub.s32 0, %v566_v32  ;;  %v571_v35 = vsub.s32 1, %v566_v32  ;;  %s1608_s27 = sshll.u32 %s2340_s11, 3  ;;  %s1609_s28 = sshll.u32 %s2340_s11, 1  ;;  %vm1353_vm8 = vcmask 254976  }
  0x8f   : > { %613 = vmatprep.subr.bf16.mxu0 %v1771_v12  ;;  %s2508_s18 = scalar_lea.vmem [#allocation12], %s1608_s27  ;;  %s1643_s22 = sshll.u32 %s2199_s13, 5 }
  0x90   : > { %v568_v36 = vrot.slane %v563_v34, %v567_v33  ;;  %v572_v37 = vrot.slane %v563_v34, %v571_v35  ;;  %s2558_s25 = scalar_lea.vmem [#allocation15], %s1609_s28  ;;  %s438_s24 = scalar_lea.vmem [#allocation13], %s1609_s28 }
  0x91   : > { %s1410_s29 = sshll.u32 %s2558_s25, 4  ;;  %s1397_s17 = sshll.u32 %s438_s24, 4  ;;  %s2568_s17 = int_to_ptr.vmem [resolvable:$true] %s1397_s17  ;;  %s2587_s29 = int_to_ptr.vmem [resolvable:$true] %s1410_s29 }
  0x92   : > { %614 = vmatpush1.bf16.msra.mxu0 %v1769_v14  ;;  %s1642_s21 = sshll.u32 %s2199_s13, 7  ;;  %s1384_s15 = sshll.u32 %s2508_s18, 4  ;;  %s2575_s15 = int_to_ptr.vmem [resolvable:$true] %s1384_s15 }
  0x93   : > { %770 = vmatprep.subr.bf16.mxu0 %v2363_v13  ;;  %s2566_s2 = scalar_lea.hbm %s2686_s8, %s1643_s22  ;;  %s2585_s20 = scalar_lea.hbm %s2687_s9, %s1643_s22 }
  0x94   : > { %s2591_s26 = scalar_lea.sflag [#allocation14], %s380_s4  ;;  %p2718_p10 = scmp.ne.s32.totalorder %s2710_s23, 0 }
 0x14d   : > { %v493_v7 = vpop.f32.mrf.mxu0 }
 0x14e   : > { %v499_v8 = vpack.c.bf16 %v493_v7, %v493_v7 }
 0x14f   : > { %v1655_v9 = vpop.f32.mrf.mxu0 }
 0x150   : > { %1660 = vmatmul.mubr.msk.bf16.vlgmr.msra.gmra.mxu1 %vm513_vm3, %v499_v8 }
 0x151   : > { %v496_v10 = vpop.f32.mrf.mxu0  ;;  %682 = vmatpush1.bf16.msra.mxu1 %v2365_v15  ;;  %701 = vmatprep.mubr.bf16.mxu1 %v2121_v17 }
 0x152   : > { %683 = vmatprep.subr.bf16.mxu1 %v2369_v16 }
 0x153   : > { %v1656_v11 = vpop.f32.mrf.mxu0 }
 0x155   : > { %684 = vmatpush1.bf16.msra.mxu1 %v2373_v18 }
 0x156   : > { %856 = vmatprep.subr.bf16.mxu1 %v2363_v13 }
 0x158   : > { %702 = vmatmul.mubr.bf16.vlgmr.msra.gmra.mxu1 %v2121_v17 }
 0x159   : > { %857 = vmatpush1.bf16.msra.mxu1 %v2365_v15  ;;  %876 = vmatprep.mubr.bf16.mxu1 %v2121_v17 }
 0x15a   : > { %858 = vmatprep.subr.bf16.mxu1 %v2369_v16 }
 0x15d   : > { %859 = vmatpush1.bf16.msra.mxu1 %v2373_v18 }
 0x15e   : > { %1028 = vmatprep.subr.bf16.mxu1 %v2363_v13 }
 0x210   : > { %v551_v20 = vpop.f32.mrf.mxu1 }
 0x211   : > { %v552_v21 = vadd.f32 %v1612_v19, %v551_v20 }
 0x212   : > { %v1661_v22 = vpop.f32.mrf.mxu1 }
 0x213   : > { %v557_v23 = vmax.f32 %v552_v21, 0.0 }
 0x214   : > { %v554_v24 = vpop.f32.mrf.mxu1 }
 0x215   : > { %v558_v25 = vpack.c.bf16 %v557_v23, %v557_v23 }
 0x216   : > { %v1662_v26 = vpop.f32.mrf.mxu1 }
 0x217   : > { %1619 = vmatmul.mubr.msk.bf16.vlgmr.msra.gmra.mxu0 %vm595_vm4, %v558_v25 }
 0x218   : > { %771 = vmatpush1.bf16.msra.mxu0 %v2365_v15  ;;  %790 = vmatprep.mubr.bf16.mxu0 %v2121_v17  ;;  %v703_v27 = vpop.f32.mrf.mxu1 }
 0x219   : > { %772 = vmatprep.subr.bf16.mxu0 %v2369_v16 }
 0x21a   : > { %v705_v28 = vpop.f32.mrf.mxu1 }
 0x21c   : > { %773 = vmatpush1.bf16.msra.mxu0 %v2373_v18  ;;  %v707_v29 = vpop.f32.mrf.mxu1 }
 0x21d   : > { %942 = vmatprep.subr.bf16.mxu0 %v2363_v13 }
 0x21e   : > { %v708_v30 = vpop.f32.mrf.mxu1 }
 0x2d7   : > { %v633_v38 = vpop.f32.mrf.mxu0 }
 0x2d8   : > { %v634_v39 = vadd.f32 %v633_v38, %v568_v36 }
 0x2d9   : > { %v635_v40 = vpop.f32.mrf.mxu0 }
 0x2da   : > { %640 = vst [vmem:[#allocation2] sm:$0xff] %v634_v39  ;;  %v636_v41 = vadd.f32 %v635_v40, %v572_v37 }
 0x2db   : > { %v637_v42 = vpop.f32.mrf.mxu0 }
 0x2dc   : > { %641 = vst [vmem:[#allocation2 + $0x8] sm:$0xff] %v636_v41 }
 0x2dd   : > { %v638_v43 = vpop.f32.mrf.mxu0 }
 0x2e1   : > { %v710_v44 = vld [vmem:[#allocation2] ss:$0 sm:$0xff]  ;;  %v799_v1 = vld [vmem:[#allocation2 + $0x1] ss:$0 sm:$0xff]  ;;  %v885_v30 = vld [vmem:[#allocation2 + $0x2] ss:$0 sm:$0xff] }
 0x2e2   : > { %v712_v46 = vadd.f32 %v710_v44, %v703_v27 }
 0x2e3   : > { %v711_v45 = vld [vmem:[#allocation2 + $0xf] ss:$0 sm:$0xff]  ;;  %v800_v3 = vld [vmem:[#allocation2 + $0xe] ss:$0 sm:$0xff]  ;;  %v886_v32 = vld [vmem:[#allocation2 + $0xd] ss:$0 sm:$0xff] }
 0x2e4   : > { %v713_v47 = vadd.f32 %v711_v45, %v705_v28 }
 0x2e6   : > { %v715_v48 = vsel %vm714_vm5, %v712_v46, %v713_v47 }
 0x2e7   : > { %1778 = vtanh.f32 %v715_v48  ;;  %v1624_v50 = vmul.f32 -1.442695, %v715_v48 }
 0x2e9   : > { %1780 = vpow2.f32 %v1624_v50 }
 0x2f4   : > { %v1779_v49 = vpop.eup %1778 }
 0x2f5   : > { %725 = vrot.lane.b32.xlu0 %v1779_v49, %s2122_s14 }
 0x2f6   : > { %v1781_v51 = vpop.eup %1780 }
 0x2f7   : > { %v719_v52 = vadd.f32 1.0, %v1781_v51 }
 0x2f9   : > { %1782 = vrcp.f32 %v719_v52 }
 0x306   : > { %v1783_v53 = vpop.eup %1782 }
 0x307   : > { %v723_v56 = vmul.f32 0.0, %v1783_v53 }
 0x367   : > { %v726_v54 = vpop.permute.xlu0 %725 }
 0x368   : > { %v728_v55 = vmul.f32 %v1783_v53, %v726_v54  ;;  %v971_v54 = vld [vmem:[#allocation2 + $0x3] ss:$0 sm:$0xff] }
 0x36a   : > { %730 = vrot.lane.b32.xlu0 %v728_v55, %s2122_s14 }
 0x3dc   : > { %v731_v57 = vpop.permute.xlu0 %730 }
 0x3dd   : > { %v733_v58 = vadd.f32 %v731_v57, %v723_v56  ;;  %v972_v56 = vld [vmem:[#allocation2 + $0xc] ss:$0 sm:$0xff] }
 0x3df   : > { %1784 = vtanh.f32 %v733_v58 }
 0x3ec   : > { %v1785_v59 = vpop.eup %1784 }
 0x3ed   : > { %736 = vrot.lane.b32.xlu1 %v1785_v59, %s2122_s14 }
 0x45f   : > { %v737_v60 = vpop.permute.xlu1 %736 }
 0x460   : > { %v2401_v61 = vmul.f32 %v1783_v53, %v737_v60 }
 0x462   : > { %v751_v62 = vpack.c.bf16 %v2401_v61, %v2401_v61 }
 0x464   : > { %753 = vrot.lane.b32.xlu1 %v751_v62, %s2123_s19 }
 0x4d6   : > { %v754_v63 = vpop.permute.xlu1 %753 }
 0x4d7   : > { %1625 = vmatmul.mubr.msk.bf16.vlgmr.msra.gmra.mxu0 %vm595_vm4, %v754_v63 }
 0x4d8   : > { %943 = vmatpush1.bf16.msra.mxu0 %v2365_v15  ;;  %962 = vmatprep.mubr.bf16.mxu0 %v2121_v17 }
 0x4d9   : > { %944 = vmatprep.subr.bf16.mxu0 %v2369_v16 }
 0x4dc   : > { %945 = vmatpush1.bf16.msra.mxu0 %v2373_v18 }
 0x4dd   : > { %1114 = vmatprep.subr.bf16.mxu0 %v2363_v13 }
 0x597   : > { %v792_v0 = vpop.f32.mrf.mxu0 }
 0x598   : > { %v801_v4 = vadd.f32 %v799_v1, %v792_v0 }
 0x599   : > { %v794_v2 = vpop.f32.mrf.mxu0 }
 0x59a   : > { %v802_v5 = vadd.f32 %v800_v3, %v794_v2 }
 0x59b   : > { %v796_v6 = vpop.f32.mrf.mxu0 }
 0x59c   : > { %v803_v7 = vsel %vm714_vm5, %v801_v4, %v802_v5 }
 0x59d   : > { %1786 = vtanh.f32 %v803_v7  ;;  %v797_v8 = vpop.f32.mrf.mxu0  ;;  %v1626_v10 = vmul.f32 -1.442695, %v803_v7 }
 0x59f   : > { %1788 = vpow2.f32 %v1626_v10 }
 0x5aa   : > { %v1787_v9 = vpop.eup %1786 }
 0x5ab   : > { %813 = vrot.lane.b32.xlu0 %v1787_v9, %s2122_s14 }
 0x5ac   : > { %v1789_v11 = vpop.eup %1788 }
 0x5ad   : > { %v807_v12 = vadd.f32 1.0, %v1789_v11 }
 0x5af   : > { %1790 = vrcp.f32 %v807_v12 }
 0x5bc   : > { %v1791_v14 = vpop.eup %1790 }
 0x5bd   : > { %v811_v21 = vmul.f32 %v1791_v14, %v733_v58 }
 0x61d   : > { %v814_v19 = vpop.permute.xlu0 %813 }
 0x61e   : > { %v816_v20 = vmul.f32 %v1791_v14, %v814_v19  ;;  %v1057_v19 = vld [vmem:[#allocation2 + $0x4] ss:$0 sm:$0xff] }
 0x620   : > { %818 = vrot.lane.b32.xlu1 %v816_v20, %s2122_s14 }
 0x692   : > { %v819_v22 = vpop.permute.xlu1 %818 }
 0x693   : > { %v821_v23 = vadd.f32 %v819_v22, %v811_v21  ;;  %v1058_v21 = vld [vmem:[#allocation2 + $0xb] ss:$0 sm:$0xff] }
 0x695   : > { %1792 = vtanh.f32 %v821_v23 }
 0x6a2   : > { %v1793_v24 = vpop.eup %1792 }
 0x6a3   : > { %824 = vrot.lane.b32.xlu0 %v1793_v24, %s2122_s14 }
 0x715   : > { %v825_v25 = vpop.permute.xlu0 %824 }
 0x716   : > { %v2416_v26 = vmul.f32 %v1791_v14, %v825_v25 }
 0x718   : > { %v837_v27 = vpack.c.bf16 %v2416_v26, %v2416_v26 }
 0x71a   : > { %839 = vrot.lane.b32.xlu1 %v837_v27, %s2123_s19 }
 0x78c   : > { %v840_v28 = vpop.permute.xlu1 %839 }
 0x78d   : > { %1627 = vmatmul.mubr.msk.bf16.vlgmr.msra.gmra.mxu1 %vm595_vm4, %v840_v28 }
 0x78e   : > { %1029 = vmatpush1.bf16.msra.mxu1 %v2365_v15  ;;  %1048 = vmatprep.mubr.bf16.mxu1 %v2121_v17 }
 0x78f   : > { %1030 = vmatprep.subr.bf16.mxu1 %v2369_v16 }
 0x792   : > { %1031 = vmatpush1.bf16.msra.mxu1 %v2373_v18 }
 0x793   : > { %1200 = vmatprep.subr.bf16.mxu1 %v2363_v13 }
 0x84d   : > { %v878_v29 = vpop.f32.mrf.mxu1 }
 0x84e   : > { %v887_v33 = vadd.f32 %v885_v30, %v878_v29 }
 0x84f   : > { %v880_v31 = vpop.f32.mrf.mxu1 }
 0x850   : > { %v888_v34 = vadd.f32 %v886_v32, %v880_v31 }
 0x851   : > { %v882_v35 = vpop.f32.mrf.mxu1 }
 0x852   : > { %v889_v36 = vsel %vm714_vm5, %v887_v33, %v888_v34 }
 0x853   : > { %1794 = vtanh.f32 %v889_v36  ;;  %v883_v37 = vpop.f32.mrf.mxu1  ;;  %v1628_v39 = vmul.f32 -1.442695, %v889_v36 }
 0x855   : > { %1796 = vpow2.f32 %v1628_v39 }
 0x860   : > { %v1795_v38 = vpop.eup %1794 }
 0x861   : > { %899 = vrot.lane.b32.xlu0 %v1795_v38, %s2122_s14 }
 0x862   : > { %v1797_v40 = vpop.eup %1796 }
 0x863   : > { %v893_v41 = vadd.f32 1.0, %v1797_v40 }
 0x865   : > { %1798 = vrcp.f32 %v893_v41 }
 0x872   : > { %v1799_v42 = vpop.eup %1798 }
 0x873   : > { %v897_v45 = vmul.f32 %v1799_v42, %v821_v23 }
 0x8d3   : > { %v900_v43 = vpop.permute.xlu0 %899 }
 0x8d4   : > { %v902_v44 = vmul.f32 %v1799_v42, %v900_v43 }
 0x8d6   : > { %904 = vrot.lane.b32.xlu1 %v902_v44, %s2122_s14  ;;  %v1143_v44 = vld [vmem:[#allocation2 + $0x5] ss:$0 sm:$0xff] }
 0x948   : > { %v905_v46 = vpop.permute.xlu1 %904 }
 0x949   : > { %v907_v47 = vadd.f32 %v905_v46, %v897_v45  ;;  %v1144_v46 = vld [vmem:[#allocation2 + $0xa] ss:$0 sm:$0xff] }
 0x94b   : > { %1800 = vtanh.f32 %v907_v47 }
 0x958   : > { %v1801_v48 = vpop.eup %1800 }
 0x959   : > { %910 = vrot.lane.b32.xlu0 %v1801_v48, %s2122_s14 }
 0x9cb   : > { %v911_v49 = vpop.permute.xlu0 %910 }
 0x9cc   : > { %v2431_v50 = vmul.f32 %v1799_v42, %v911_v49 }
 0x9ce   : > { %v923_v51 = vpack.c.bf16 %v2431_v50, %v2431_v50 }
 0x9d0   : > { %925 = vrot.lane.b32.xlu1 %v923_v51, %s2123_s19 }
 0xa42   : > { %v926_v52 = vpop.permute.xlu1 %925 }
 0xa43   : > { %1629 = vmatmul.mubr.msk.bf16.vlgmr.msra.gmra.mxu0 %vm595_vm4, %v926_v52 }
 0xa44   : > { %1115 = vmatpush1.bf16.msra.mxu0 %v2365_v15  ;;  %1134 = vmatprep.mubr.bf16.mxu0 %v2121_v17 }
 0xa45   : > { %1116 = vmatprep.subr.bf16.mxu0 %v2369_v16 }
 0xa48   : > { %1117 = vmatpush1.bf16.msra.mxu0 %v2373_v18 }
 0xa49   : > { %1286 = vmatprep.subr.bf16.mxu0 %v2363_v13 }
 0xb03   : > { %v964_v53 = vpop.f32.mrf.mxu0 }
 0xb04   : > { %v973_v57 = vadd.f32 %v971_v54, %v964_v53 }
 0xb05   : > { %v966_v55 = vpop.f32.mrf.mxu0 }
 0xb06   : > { %v974_v58 = vadd.f32 %v972_v56, %v966_v55 }
 0xb07   : > { %v968_v59 = vpop.f32.mrf.mxu0 }
 0xb08   : > { %v975_v60 = vsel %vm714_vm5, %v973_v57, %v974_v58 }
 0xb09   : > { %1802 = vtanh.f32 %v975_v60  ;;  %v969_v62 = vpop.f32.mrf.mxu0  ;;  %v1630_v0 = vmul.f32 -1.442695, %v975_v60 }
 0xb0b   : > { %1804 = vpow2.f32 %v1630_v0 }
 0xb16   : > { %v1803_v63 = vpop.eup %1802 }
 0xb17   : > { %985 = vrot.lane.b32.xlu0 %v1803_v63, %s2122_s14 }
 0xb18   : > { %v1805_v1 = vpop.eup %1804 }
 0xb19   : > { %v979_v2 = vadd.f32 1.0, %v1805_v1 }
 0xb1b   : > { %1806 = vrcp.f32 %v979_v2  ;;  %v1229_v2 = vld [vmem:[#allocation2 + $0x6] ss:$0 sm:$0xff] }
 0xb28   : > { %v1807_v13 = vpop.eup %1806 }
 0xb29   : > { %v983_v5 = vmul.f32 %v1807_v13, %v907_v47 }
 0xb89   : > { %v986_v3 = vpop.permute.xlu0 %985 }
 0xb8a   : > { %v988_v4 = vmul.f32 %v1807_v13, %v986_v3  ;;  %v1230_v3 = vld [vmem:[#allocation2 + $0x9] ss:$0 sm:$0xff] }
 0xb8c   : > { %990 = vrot.lane.b32.xlu1 %v988_v4, %s2122_s14 }
 0xbfe   : > { %v991_v6 = vpop.permute.xlu1 %990 }
 0xbff   : > { %v993_v7 = vadd.f32 %v991_v6, %v983_v5 }
 0xc01   : > { %1808 = vtanh.f32 %v993_v7 }
 0xc0e   : > { %v1809_v8 = vpop.eup %1808 }
 0xc0f   : > { %996 = vrot.lane.b32.xlu0 %v1809_v8, %s2122_s14 }
 0xc81   : > { %v997_v9 = vpop.permute.xlu0 %996 }
 0xc82   : > { %v2446_v10 = vmul.f32 %v1807_v13, %v997_v9 }
 0xc84   : > { %v1009_v11 = vpack.c.bf16 %v2446_v10, %v2446_v10 }
 0xc86   : > { %1011 = vrot.lane.b32.xlu1 %v1009_v11, %s2123_s19 }
 0xcf8   : > { %v1012_v12 = vpop.permute.xlu1 %1011 }
 0xcf9   : > { %1631 = vmatmul.mubr.msk.bf16.vlgmr.msra.gmra.mxu1 %vm595_vm4, %v1012_v12 }
 0xcfa   : > { %1201 = vmatpush1.bf16.msra.mxu1 %v2365_v15  ;;  %1220 = vmatprep.mubr.bf16.mxu1 %v2121_v17 }
 0xcfb   : > { %1202 = vmatprep.subr.bf16.mxu1 %v2369_v16 }
 0xcfe   : > { %1203 = vmatpush1.bf16.msra.mxu1 %v2373_v18 }
 0xdb9   : > { %v1050_v14 = vpop.f32.mrf.mxu1 }
 0xdba   : > { %v1059_v22 = vadd.f32 %v1057_v19, %v1050_v14 }
 0xdbb   : > { %v1052_v20 = vpop.f32.mrf.mxu1 }
 0xdbc   : > { %v1060_v23 = vadd.f32 %v1058_v21, %v1052_v20 }
 0xdbd   : > { %v1054_v24 = vpop.f32.mrf.mxu1 }
 0xdbe   : > { %v1061_v25 = vsel %vm714_vm5, %v1059_v22, %v1060_v23 }
 0xdbf   : > { %1810 = vtanh.f32 %v1061_v25  ;;  %v1055_v27 = vpop.f32.mrf.mxu1  ;;  %v1632_v29 = vmul.f32 -1.442695, %v1061_v25 }
 0xdc1   : > { %1812 = vpow2.f32 %v1632_v29 }
 0xdcc   : > { %v1811_v28 = vpop.eup %1810 }
 0xdcd   : > { %1071 = vrot.lane.b32.xlu0 %v1811_v28, %s2122_s14 }
 0xdce   : > { %v1813_v30 = vpop.eup %1812 }
 0xdcf   : > { %v1065_v31 = vadd.f32 1.0, %v1813_v30 }
 0xdd1   : > { %1814 = vrcp.f32 %v1065_v31 }
 0xdde   : > { %v1815_v32 = vpop.eup %1814 }
 0xddf   : > { %v1069_v35 = vmul.f32 %v1815_v32, %v993_v7 }
 0xe3f   : > { %v1072_v33 = vpop.permute.xlu0 %1071 }
 0xe40   : > { %v1074_v34 = vmul.f32 %v1815_v32, %v1072_v33 }
 0xe42   : > { %1076 = vrot.lane.b32.xlu1 %v1074_v34, %s2122_s14  ;;  %v1316_v34 = vld [vmem:[#allocation2 + $0x8] ss:$0 sm:$0xff] }
 0xeb4   : > { %v1077_v36 = vpop.permute.xlu1 %1076 }
 0xeb5   : > { %v1079_v37 = vadd.f32 %v1077_v36, %v1069_v35 }
 0xeb7   : > { %1816 = vtanh.f32 %v1079_v37 }
 0xec4   : > { %v1817_v38 = vpop.eup %1816 }
 0xec5   : > { %1082 = vrot.lane.b32.xlu0 %v1817_v38, %s2122_s14 }
 0xf37   : > { %v1083_v39 = vpop.permute.xlu0 %1082 }
 0xf38   : > { %v2460_v40 = vmul.f32 %v1815_v32, %v1083_v39  ;;  %v1315_v32 = vld [vmem:[#allocation2 + $0x7] ss:$0 sm:$0xff] }
 0xf3a   : > { %v1095_v41 = vpack.c.bf16 %v2460_v40, %v2460_v40 }
 0xf3c   : > { %1097 = vrot.lane.b32.xlu1 %v1095_v41, %s2123_s19 }
 0xfae   : > { %v1098_v42 = vpop.permute.xlu1 %1097 }
 0xfaf   : > { %1633 = vmatmul.mubr.msk.bf16.vlgmr.msra.gmra.mxu0 %vm595_vm4, %v1098_v42 }
 0xfb0   : > { %1287 = vmatpush1.bf16.msra.mxu0 %v2365_v15  ;;  %1306 = vmatprep.mubr.bf16.mxu0 %v2121_v17 }
 0xfb1   : > { %1288 = vmatprep.subr.bf16.mxu0 %v2369_v16 }
 0xfb4   : > { %1289 = vmatpush1.bf16.msra.mxu0 %v2373_v18 }
0x106f   : > { %v1136_v43 = vpop.f32.mrf.mxu0 }
0x1070   : > { %v1145_v47 = vadd.f32 %v1143_v44, %v1136_v43 }
0x1071   : > { %v1138_v45 = vpop.f32.mrf.mxu0 }
0x1072   : > { %v1146_v48 = vadd.f32 %v1144_v46, %v1138_v45 }
0x1073   : > { %v1140_v49 = vpop.f32.mrf.mxu0 }
0x1074   : > { %v1147_v51 = vsel %vm714_vm5, %v1145_v47, %v1146_v48 }
0x1075   : > { %1818 = vtanh.f32 %v1147_v51  ;;  %v1141_v52 = vpop.f32.mrf.mxu0  ;;  %v1634_v15 = vmul.f32 -1.442695, %v1147_v51 }
0x1077   : > { %1820 = vpow2.f32 %v1634_v15 }
0x1082   : > { %v1819_v53 = vpop.eup %1818 }
0x1083   : > { %1157 = vrot.lane.b32.xlu0 %v1819_v53, %s2122_s14 }
0x1084   : > { %v1821_v17 = vpop.eup %1820 }
0x1085   : > { %v1151_v16 = vadd.f32 1.0, %v1821_v17 }
0x1087   : > { %1822 = vrcp.f32 %v1151_v16 }
0x1094   : > { %v1823_v18 = vpop.eup %1822 }
0x1095   : > { %v1155_v56 = vmul.f32 %v1823_v18, %v1079_v37 }
0x10f5   : > { %v1158_v54 = vpop.permute.xlu0 %1157 }
0x10f6   : > { %v1160_v55 = vmul.f32 %v1823_v18, %v1158_v54 }
0x10f8   : > { %1162 = vrot.lane.b32.xlu1 %v1160_v55, %s2122_s14 }
0x116a   : > { %v1163_v57 = vpop.permute.xlu1 %1162 }
0x116b   : > { %v1165_v58 = vadd.f32 %v1163_v57, %v1155_v56 }
0x116d   : > { %1824 = vtanh.f32 %v1165_v58 }
0x117a   : > { %v1825_v59 = vpop.eup %1824 }
0x117b   : > { %1168 = vrot.lane.b32.xlu0 %v1825_v59, %s2122_s14 }
0x11ed   : > { %v1169_v60 = vpop.permute.xlu0 %1168 }
0x11ee   : > { %v2474_v62 = vmul.f32 %v1823_v18, %v1169_v60 }
0x11f0   : > { %v1181_v63 = vpack.c.bf16 %v2474_v62, %v2474_v62 }
0x11f2   : > { %1183 = vrot.lane.b32.xlu1 %v1181_v63, %s2123_s19 }
0x1264   : > { %v1184_v0 = vpop.permute.xlu1 %1183 }
0x1265   : > { %1635 = vmatmul.mubr.msk.bf16.vlgmr.msra.gmra.mxu1 %vm595_vm4, %v1184_v0 }
0x1325   : > { %v1222_v1 = vpop.f32.mrf.mxu1 }
0x1326   : > { %v1231_v4 = vadd.f32 %v1229_v2, %v1222_v1 }
0x1327   : > { %v1224_v13 = vpop.f32.mrf.mxu1 }
0x1328   : > { %v1232_v5 = vadd.f32 %v1230_v3, %v1224_v13 }
0x1329   : > { %v1226_v6 = vpop.f32.mrf.mxu1 }
0x132a   : > { %v1233_v7 = vsel %vm714_vm5, %v1231_v4, %v1232_v5 }
0x132b   : > { %1826 = vtanh.f32 %v1233_v7  ;;  %v1227_v8 = vpop.f32.mrf.mxu1  ;;  %v1636_v11 = vmul.f32 -1.442695, %v1233_v7 }
0x132d   : > { %1828 = vpow2.f32 %v1636_v11 }
0x1338   : > { %v1827_v9 = vpop.eup %1826 }
0x1339   : > { %1243 = vrot.lane.b32.xlu0 %v1827_v9, %s2122_s14 }
0x133a   : > { %v1829_v12 = vpop.eup %1828 }
0x133b   : > { %v1237_v14 = vadd.f32 1.0, %v1829_v12 }
0x133d   : > { %1830 = vrcp.f32 %v1237_v14 }
0x134a   : > { %v1831_v19 = vpop.eup %1830 }
0x134b   : > { %v1241_v22 = vmul.f32 %v1831_v19, %v1165_v58 }
0x13ab   : > { %v1244_v20 = vpop.permute.xlu0 %1243 }
0x13ac   : > { %v1246_v21 = vmul.f32 %v1831_v19, %v1244_v20 }
0x13ae   : > { %1248 = vrot.lane.b32.xlu1 %v1246_v21, %s2122_s14 }
0x1420   : > { %v1249_v23 = vpop.permute.xlu1 %1248 }
0x1421   : > { %v1251_v24 = vadd.f32 %v1249_v23, %v1241_v22 }
0x1423   : > { %1832 = vtanh.f32 %v1251_v24 }
0x1430   : > { %v1833_v25 = vpop.eup %1832 }
0x1431   : > { %1254 = vrot.lane.b32.xlu0 %v1833_v25, %s2122_s14 }
0x14a3   : > { %v1255_v27 = vpop.permute.xlu0 %1254 }
0x14a4   : > { %v2484_v28 = vmul.f32 %v1831_v19, %v1255_v27 }
0x14a6   : > { %v1267_v29 = vpack.c.bf16 %v2484_v28, %v2484_v28 }
0x14a8   : > { %1269 = vrot.lane.b32.xlu1 %v1267_v29, %s2123_s19 }
0x151a   : > { %v1270_v30 = vpop.permute.xlu1 %1269 }
0x151b   : > { %1637 = vmatmul.mubr.msk.bf16.vlgmr.msra.gmra.mxu0 %vm595_vm4, %v1270_v30 }
0x15db   : > { %v1308_v31 = vpop.f32.mrf.mxu0 }
0x15dc   : > { %v1317_v35 = vadd.f32 %v1315_v32, %v1308_v31 }
0x15dd   : > { %v1310_v33 = vpop.f32.mrf.mxu0 }
0x15de   : > { %v1318_v36 = vadd.f32 %v1316_v34, %v1310_v33 }
0x15df   : > { %v1312_v37 = vpop.f32.mrf.mxu0 }
0x15e0   : > { %v1319_v38 = vsel %vm714_vm5, %v1317_v35, %v1318_v36 }
0x15e1   : > { %1834 = vtanh.f32 %v1319_v38  ;;  %v1313_v39 = vpop.f32.mrf.mxu0  ;;  %v1638_v42 = vmul.f32 -1.442695, %v1319_v38 }
0x15e3   : > { %1836 = vpow2.f32 %v1638_v42 }
0x15ee   : > { %v1835_v41 = vpop.eup %1834 }
0x15ef   : > { %1329 = vrot.lane.b32.xlu0 %v1835_v41, %s2122_s14 }
0x15f0   : > { %v1837_v43 = vpop.eup %1836 }
0x15f1   : > { %v1323_v44 = vadd.f32 1.0, %v1837_v43 }
0x15f3   : > { %1838 = vrcp.f32 %v1323_v44 }
0x1600   : > { %v1839_v45 = vpop.eup %1838 }
0x1601   : > { %v1327_v48 = vmul.f32 %v1839_v45, %v1251_v24 }
0x1661   : > { %v1330_v46 = vpop.permute.xlu0 %1329 }
0x1662   : > { %v1332_v47 = vmul.f32 %v1839_v45, %v1330_v46 }
0x1664   : > { %1334 = vrot.lane.b32.xlu1 %v1332_v47, %s2122_s14 }
0x1668   : > { %741 = vrot.lane.b32.xlu1 %v2401_v61, %s2123_s19 }
0x166c   : > { %829 = vrot.lane.b32.xlu1 %v2416_v26, %s2123_s19 }
0x1670   : > { %915 = vrot.lane.b32.xlu1 %v2431_v50, %s2123_s19 }
0x1674   : > { %1001 = vrot.lane.b32.xlu1 %v2446_v10, %s2123_s19 }
0x1678   : > { %1091 = vrot.lane.b32.xlu1 %v2460_v40, %s2124_s6 }
0x167c   : > { %1177 = vrot.lane.b32.xlu1 %v2474_v62, %s2124_s6 }
0x1680   : > { %1263 = vrot.lane.b32.xlu1 %v2484_v28, %s2124_s6 }
0x16d6   : > { %v1335_v49 = vpop.permute.xlu1 %1334 }
0x16d7   : > { %v1337_v51 = vadd.f32 %v1335_v49, %v1327_v48 }
0x16d9   : > { %1840 = vtanh.f32 %v1337_v51 }
0x16da   : > { %v742_v52 = vpop.permute.xlu1 %741 }
0x16db   : > { %745 = vst.msk [vmem:[%s2508_s18] sm:$0x1] %vm744_vm6, %v742_v52 }
0x16de   : > { %v830_v53 = vpop.permute.xlu1 %829 }
0x16df   : > { %832 = vst.msk [vmem:[%s2508_s18 + $0x1] sm:$0x1] %vm744_vm6, %v830_v53 }
0x16e2   : > { %v916_v15 = vpop.permute.xlu1 %915 }
0x16e3   : > { %918 = vst.msk [vmem:[%s2508_s18 + $0x2] sm:$0x1] %vm744_vm6, %v916_v15 }
0x16e6   : > { %v1841_v17 = vpop.eup %1840  ;;  %v1002_v16 = vpop.permute.xlu1 %1001 }
0x16e7   : > { %1004 = vst.msk [vmem:[%s2508_s18 + $0x3] sm:$0x1] %vm744_vm6, %v1002_v16  ;;  %1340 = vrot.lane.b32.xlu0 %v1841_v17, %s2122_s14  ;;  %s2125_s14 = smov [#allocation13]  }
0x16ea   : > { %v1092_v18 = vpop.permute.xlu1 %1091 }
0x16eb   : > { %1094 = vst.msk [vmem:[%s2508_s18 + $0x2] sm:$0x2] %vm749_vm7, %v1092_v18  ;;  %746 = vrot.lane.b32.xlu0 %v2401_v61, %s2124_s6 }
0x16ee   : > { %v1178_v54 = vpop.permute.xlu1 %1177 }
0x16ef   : > { %1180 = vst.msk [vmem:[%s2508_s18 + $0x1] sm:$0x2] %vm749_vm7, %v1178_v54  ;;  %833 = vrot.lane.b32.xlu0 %v2416_v26, %s2124_s6 }
0x16f2   : > { %v1264_v55 = vpop.permute.xlu1 %1263 }
0x16f3   : > { %1266 = vst.msk [vmem:[%s2508_s18] sm:$0x2] %vm749_vm7, %v1264_v55  ;;  %919 = vrot.lane.b32.xlu0 %v2431_v50, %s2124_s6 }
0x16f7   : > { %1005 = vrot.lane.b32.xlu0 %v2446_v10, %s2124_s6 }
0x16fb   : > { %1087 = vrot.lane.b32.xlu0 %v2460_v40, %s2123_s19 }
0x16ff   : > { %1173 = vrot.lane.b32.xlu0 %v2474_v62, %s2123_s19 }
0x1703   : > { %1259 = vrot.lane.b32.xlu0 %v2484_v28, %s2123_s19 }
0x1759   : > { %v1341_v61 = vpop.permute.xlu0 %1340 }
0x175a   : > { %v1343_v26 = vmul.f32 %v1839_v45, %v1341_v61 }
0x175c   : > { %1349 = vrot.lane.b32.xlu0 %v1343_v26, %s2124_s6  ;;  %1345 = vrot.lane.b32.xlu1 %v1343_v26, %s2123_s19  ;;  %s1980_s19 = sshll.u32 %s2125_s14, 4  ;;  %s1981_s19 = int_to_ptr.vmem [resolvable:$false] %s1980_s19 }
0x175d   : > { %v747_v50 = vpop.permute.xlu0 %746  ;;  %p1983_p3 = scmp.lt.s32.totalorder %s2568_s17, %s1981_s19 }
0x175e   : > { %750 = vst.msk [vmem:[%s2508_s18 + $0x6] sm:$0x2] %vm749_vm7, %v747_v50 }
0x1760   : > { %1356 = vrot.lane.b32.xlu1 %v1337_v51, %s2124_s6  ;;  %s2573_s6 = scalar_lea.hbm %s2685_s7, %s1642_s21  ;;  %s1976_s21 = scalar_lea.vmem %s2568_s17, 32 }
0x1761   : > { %v834_v10 = vpop.permute.xlu0 %833  ;;  %p1977_p5 = scmp.ne.s32.totalorder %s2568_s17, %s1976_s21 }
0x1762   : > { %836 = vst.msk [vmem:[%s2508_s18 + $0x5] sm:$0x2] %vm749_vm7, %v834_v10 }
0x1763   : > { %p1978_p1 = pnand %p1977_p5, %p2718_p10 }
0x1765   : > { %v920_v40 = vpop.permute.xlu0 %919  ;;  %p1979_p2 = pneg %p1978_p1 }
0x1766   : > { %922 = vst.msk [vmem:[%s2508_s18 + $0x4] sm:$0x2] %vm749_vm7, %v920_v40 }
0x1769   : > { %v1006_v56 = vpop.permute.xlu0 %1005 }
0x176a   : > { %1008 = vst.msk [vmem:[%s2508_s18 + $0x3] sm:$0x2] %vm749_vm7, %v1006_v56 }
0x176d   : > { %v1088_v57 = vpop.permute.xlu0 %1087 }
0x176e   : > { %1090 = vst.msk [vmem:[%s2508_s18 + $0x4] sm:$0x1] %vm744_vm6, %v1088_v57 }
0x1771   : > { %v1174_v58 = vpop.permute.xlu0 %1173 }
0x1772   : > { %1176 = vst.msk [vmem:[%s2508_s18 + $0x5] sm:$0x1] %vm744_vm6, %v1174_v58 }
0x1775   : > { %v1260_v59 = vpop.permute.xlu0 %1259 }
0x1776   : > { %1262 = vst.msk [vmem:[%s2508_s18 + $0x6] sm:$0x1] %vm744_vm6, %v1260_v59 }
0x17ce   : > { %v1346_v60 = vpop.permute.xlu1 %1345  ;;  %v1350_v62 = vpop.permute.xlu0 %1349 }
0x17cf   : > { %1348 = vst.msk [vmem:[%s2508_s18 + $0x7] sm:$0x1] %vm744_vm6, %v1346_v60 }
0x17d0   : > { %1354 = vst.msk [vmem:[%s438_s24] sm:$0x3] %vm1353_vm8, %v1346_v60  ;;  %s1982_s24 = scalar_lea.vmem %s1981_s19, 64 }
0x17d1   : > { %1352 = vst.msk [vmem:[%s2508_s18 - $0x1] sm:$0x2] %vm749_vm7, %v1350_v62  ;;  %p1984_p9 = scmp.lt.s32.totalorder %s1982_s24, %s1976_s21 }
0x17d3   : > { %p1985_p13 = por %p1984_p9, %p1983_p3 }
0x17d5   : > { %p1986_p4 = pnand %p1985_p13, %p1979_p2 }
0x17d7   : > { %1989 = shalt.err (!%p1986_p4)
}
0x17d8   : > { %s1990_s13 = scalar_lea.hbm %s2566_s2, 32  ;;  %s1994_s22 = scalar_lea.hbm %s2686_s8, 64 }
0x17d9   : > { %p1991_p8 = scmp.ne.s32.totalorder %s2566_s2, %s1990_s13  ;;  %p1995_p6 = scmp.lt.s32.totalorder %s2566_s2, %s2686_s8 }
0x17da   : > { %p1996_p12 = scmp.lt.s32.totalorder %s1994_s22, %s1990_s13 }
0x17db   : > { %p1992_p7 = pnand %p1991_p8, %p2718_p10 }
0x17dc   : > { %p1997_p0 = por %p1996_p12, %p1995_p6 }
0x17dd   : > { %p1993_p11 = pneg %p1992_p7 }
0x17df   : > { %p1998_p5 = pnand %p1997_p0, %p1993_p11 }
0x17e1   : > { %2001 = shalt.err (!%p1998_p5)
}
0x17e2   : > { %1680 = dma.vmem_to_hbm [thread:$0]  (%p2718_p10), %s2568_s17, 32, %s2566_s2, %s2591_s26  }
0x17e3   : > { %s1361_s21 = scalar_lea.sflag [#allocation5], %s2340_s11  ;;  %s2002_s14 = scalar_lea.vmem %s2575_s15, 128 }
0x17e4   : > { %p2003_p1 = scmp.ne.s32.totalorder %s2575_s15, %s2002_s14  ;;  %s2126_s19 = smov [#allocation12]  }
0x17e5   : > { %s2006_s24 = sshll.u32 %s2126_s19, 4  ;;  %s2007_s24 = int_to_ptr.vmem [resolvable:$false] %s2006_s24 }
0x17e6   : > { %p2004_p2 = pnand %p2003_p1, %p2718_p10  ;;  %s2008_s13 = scalar_lea.vmem %s2007_s24, 256 }
0x17e7   : > { %p2009_p9 = scmp.lt.s32.totalorder %s2575_s15, %s2007_s24  ;;  %p2010_p13 = scmp.lt.s32.totalorder %s2008_s13, %s2002_s14 }
0x17e8   : > { %p2005_p3 = pneg %p2004_p2 }
0x17e9   : > { %p2011_p4 = por %p2010_p13, %p2009_p9 }
0x17eb   : > { %p2012_p8 = pnand %p2011_p4, %p2005_p3 }
0x17ed   : > { %2015 = shalt.err (!%p2012_p8)
}
0x17ee   : > { %s2016_s17 = scalar_lea.hbm %s2573_s6, 128  ;;  %s2020_s4 = scalar_lea.hbm %s2685_s7, 256 }
0x17ef   : > { %p2017_p7 = scmp.ne.s32.totalorder %s2573_s6, %s2016_s17  ;;  %p2021_p12 = scmp.lt.s32.totalorder %s2573_s6, %s2685_s7 }
0x17f0   : > { %p2022_p0 = scmp.lt.s32.totalorder %s2020_s4, %s2016_s17 }
0x17f1   : > { %p2018_p11 = pnand %p2017_p7, %p2718_p10 }
0x17f2   : > { %p2023_p5 = por %p2022_p0, %p2021_p12 }
0x17f3   : > { %p2019_p6 = pneg %p2018_p11 }
0x17f5   : > { %p2024_p1 = pnand %p2023_p5, %p2019_p6 }
0x17f7   : > { %2027 = shalt.err (!%p2024_p1)
}
0x17f8   : > { %1679 = dma.vmem_to_hbm [thread:$0]  (%p2718_p10), %s2575_s15, 128, %s2573_s6, %s1361_s21   ;;  %v1357_v63 = vpop.permute.xlu1 %1356 }
0x17f9   : > { %1359 = vst.msk [vmem:[%s2558_s25] sm:$0x3] %vm1353_vm8, %v1357_v63  ;;  %s2028_s27 = scalar_lea.vmem %s2587_s29, 32  ;;  %s2127_s28 = smov [#allocation15]  }
0x17fa   : > { %p2029_p2 = scmp.ne.s32.totalorder %s2587_s29, %s2028_s27  ;;  %s2032_s14 = sshll.u32 %s2127_s28, 4  ;;  %s2033_s14 = int_to_ptr.vmem [resolvable:$false] %s2032_s14 }
0x17fb   : > { %s2034_s19 = scalar_lea.vmem %s2033_s14, 64  ;;  %p2035_p13 = scmp.lt.s32.totalorder %s2587_s29, %s2033_s14 }
0x17fc   : > { %p2030_p3 = pnand %p2029_p2, %p2718_p10  ;;  %p2036_p4 = scmp.lt.s32.totalorder %s2034_s19, %s2028_s27 }
0x17fe   : > { %p2031_p9 = pneg %p2030_p3  ;;  %p2037_p8 = por %p2036_p4, %p2035_p13 }
0x1800   : > { %p2038_p7 = pnand %p2037_p8, %p2031_p9 }
0x1802   : > { %2041 = shalt.err (!%p2038_p7)
}
0x1803   : > { %s2042_s15 = scalar_lea.hbm %s2585_s20, 32  ;;  %s2046_s21 = scalar_lea.hbm %s2687_s9, 64 }
0x1804   : > { %p2043_p11 = scmp.ne.s32.totalorder %s2585_s20, %s2042_s15  ;;  %p2047_p0 = scmp.lt.s32.totalorder %s2585_s20, %s2687_s9 }
0x1805   : > { %p2048_p5 = scmp.lt.s32.totalorder %s2046_s21, %s2042_s15 }
0x1806   : > { %p2044_p6 = pnand %p2043_p11, %p2718_p10 }
0x1807   : > { %p2049_p1 = por %p2048_p5, %p2047_p0 }
0x1808   : > { %p2045_p12 = pneg %p2044_p6 }
0x180a   : > { %p2050_p2 = pnand %p2049_p1, %p2045_p12 }
0x180c   : > { %2053 = shalt.err (!%p2050_p2)
}
0x180d   : > { %1681 = dma.vmem_to_hbm [thread:$0]  (%p2718_p10), %s2587_s29, 32, %s2585_s20, %s2591_s26  }
0x180e PF: > { %s1422_s17 = sand.u32 1, %s2096_s30   ;;  %p2719_p3 = scmp.ne.s32.totalorder %s2701_s16, 0 }
0x180f   : > { %p2720_p9 = scmp.ge.s32.totalorder %s2108_s12, 2  ;;  %s1423_s11 = scalar_lea.sflag [#allocation5], %s1422_s17 }
0x1811   : > { %p1703_p13 = pnand %p2720_p9, %p2719_p3 }
0x1813   : > { %p1704_p4 = pneg %p1703_p13 }
0x1815   : > { %2087 = dma.done.wait (%p1704_p4), %s1423_s11, 128  }
0x1816   : > { %2089 = vsyncadd (%p1704_p4), %s1423_s11, 4294967168  ;;  %s2721_s2 = sadd.s32 4294967294, %s2108_s12  }
0x1817   : > { %s1431_s4 = sand.u32 1, %s2721_s2  }
0x1818   : > { %s1432_s23 = scalar_lea.sflag [#allocation14], %s1431_s4 }
0x1819   : > { %2091 = dma.done.wait (%p1704_p4), %s1432_s23, 64  }
0x181a   : > { %2093 = vsyncadd (%p1704_p4), %s1432_s23, 4294967232  ;;  %s2722_s12 = sld [smem:[#allocation23_spill]]  ;;  %s2725_s30 = smov %s2100_s10 }
0x181b   : > { %s2723_s29 = sld [smem:[#allocation22_spill]] }
0x181c   : > { %s2724_s11 = sld [smem:[#allocation24_spill]] }
0x1820   : > { %p30_p10 = scmp.ge.s32.totalorder %s2722_s12, 4  }
0x1821   : > { %s2726_s10 = smov %s2723_s29 }
0x1822   :  { %32 = sbr.rel (!%p30_p10) target bundleno = 14 (0xe), region = 150 }
0x1827   :  { %1446 = vsyncpa [#allocation4], 1 }
0x1828   :  { %1448 = vsyncpa [#allocation4 + $0x1], 1 }
0x1829   :  { %1449 = vsyncpa [#allocation7], 1 }
0x182a   :  { %1451 = vsyncpa [#allocation7 + $0x1], 1 }
0x182b   :  { %1452 = vsyncpa [#allocation10], 1 }
0x182c   :  { %1453 = vsyncpa [#allocation5], 1 }
0x182d   :  { %1455 = vsyncpa [#allocation5 + $0x1], 1 }
0x182e   :  { %1456 = vsyncpa [#allocation14], 1 }
0x182f   :  { %1458 = vsyncpa [#allocation14 + $0x1], 1 }

</bundles_post_ra>
